<compile_context>
chip_gen: v7x
topology: tpu7x:2x2x1
jax: 0.10.0
libtpu: 0.0.40
codegen_flags: <defaults>
</compile_context>

<pallas_src>
import functools

import jax
import jax.numpy as jnp
from jax.experimental import pallas as pl
from jax.experimental.pallas import tpu as pltpu


def _round_up(x, m):
    return ((x + m - 1) // m) * m


def _transition_kernel(act_ref, mask_ref, gamma_ref, beta_ref,
                       w1_ref, b1_ref, w2_ref, b2_ref, out_ref,
                       *, eps, apply_affine):
    # ---- LayerNormFP32: compute in f32 (centered variance), cast back ----
    x = act_ref[...].astype(jnp.float32)                      # (TM, D)
    mean = jnp.mean(x, axis=-1, keepdims=True)
    xc = x - mean
    var = jnp.mean(xc * xc, axis=-1, keepdims=True)
    xn = xc * jax.lax.rsqrt(var + eps)
    if apply_affine:
        xn = xn * gamma_ref[...] + beta_ref[...]
    xn = xn.astype(w1_ref.dtype)                              # matmul operand dtype

    # ---- transition1 + ReLU: same-dtype operands, f32 accumulation ----
    h = jnp.maximum(
        jnp.dot(xn, w1_ref[...], preferred_element_type=jnp.float32)
        + b1_ref[...], 0.0)                                   # (TM, H) f32
    h = h.astype(w2_ref.dtype)

    # ---- transition2 with fused bias + mask epilogue ----
    y = jnp.dot(h, w2_ref[...], preferred_element_type=jnp.float32)
    out_ref[...] = ((y + b2_ref[...]) * mask_ref[...]).astype(out_ref.dtype)


def _vmem_capacity_bytes():
    try:
        info = pltpu.get_tpu_info()
        cap = getattr(info, "vmem_capacity_bytes", None)
        if cap:
            return int(cap)
    except Exception:
        pass
    return 64 * 1024 * 1024   # conservative: v7x per-TensorCore VMEM


def transition_forward(act, mask, params, *, eps=1e-5, tile_rows=1024,
                       fold_ln_affine=False):
    """act: (B, S, D), mask: (B, S) -> (B, S, D).

    params['w1'] is (D, H) and params['w2'] is (H, D), i.e. already (in, out)
    (the transpose of torch.nn.Linear.weight)."""
    B, S, D = act.shape
    rows = B * S
    H = params["w1"].shape[1]
    cdt = act.dtype                                  # matmul compute dtype
    isz = jnp.dtype(cdt).itemsize

    gamma = params["gamma"].astype(jnp.float32)
    beta = params["beta"].astype(jnp.float32)
    w1 = params["w1"].astype(jnp.float32)
    b1 = params["b1"].astype(jnp.float32)
    w2 = params["w2"]
    b2 = params["b2"].astype(jnp.float32)

    apply_affine = not fold_ln_affine
    if fold_ln_affine:
        # (xn*g + b) @ W1 + b1  ==  xn @ (g[:,None]*W1) + (b @ W1 + b1)
        b1 = b1 + beta @ w1
        w1 = gamma[:, None] * w1

    # Same-dtype MXU operands (f32 accumulation happens in-kernel).
    w1c = w1.astype(cdt)
    w2c = w2.astype(cdt)

    act2 = act.reshape(rows, D)                      # metadata-only reshape
    mask2 = mask.reshape(rows, 1).astype(jnp.float32)
    gamma2 = gamma.reshape(1, D)
    beta2 = beta.reshape(1, D)
    b1_2 = b1.reshape(1, H)
    b2_2 = b2.reshape(1, D)

    # ---- VMEM budgeting (hardware derived; v7x=64MiB/TC, v5e/v6e=128MiB) ----
    vmem_cap = _vmem_capacity_bytes()
    vmem_limit = max(vmem_cap - (16 << 20), 32 << 20)
    w_resident = 2 * (D * H + H * D) * isz           # conservative: 2 buffers
    per_row = (4 * D * isz                           # act-in + out tiles (x2 buf)
               + 2 * 128 * 4                         # mask tile, lane padded (x2)
               + 2 * H * 4                           # f32 hidden + cast copy
               + 3 * D * 4)                          # f32 LN temporaries
    budget = max(vmem_limit - w_resident - (2 << 20), per_row * 8)
    t = max(8, min(_round_up(tile_rows, 8), 2048))
    while t > 8 and t * per_row > budget:
        t //= 2
    if t >= rows:
        t = rows                                     # one full block, no padding
    tile_rows = t
    grid = (pl.cdiv(rows, tile_rows),)
    # TODO(synk): for huge D*H that cannot fit single-buffered in VMEM, chunk H
    # inside the kernel (emit_pipeline over H) instead of shrinking the row tile.

    cost = pl.CostEstimate(
        flops=4 * rows * D * H,
        transcendentals=rows,                        # one rsqrt per row
        bytes_accessed=(2 * rows * D * isz + rows * 4
                        + 2 * D * H * isz + (3 * D + H) * 4))

    def _run(single_buffer_consts):
        def const_spec(shape):
            if single_buffer_consts:
                return pl.BlockSpec(shape, lambda i: (0, 0),
                                    pipeline_mode=pl.Buffered(1))
            return pl.BlockSpec(shape, lambda i: (0, 0))

        in_specs = [
            pl.BlockSpec((tile_rows, D), lambda i: (i, 0)),   # act tile
            pl.BlockSpec((tile_rows, 1), lambda i: (i, 0)),   # mask tile
            const_spec((1, D)),                               # gamma
            const_spec((1, D)),                               # beta
            const_spec((D, H)),                               # w1 (in, out)
            const_spec((1, H)),                               # b1
            const_spec((H, D)),                               # w2 (in, out)
            const_spec((1, D)),                               # b2
        ]
        return pl.pallas_call(
            functools.partial(_transition_kernel, eps=eps,
                              apply_affine=apply_affine),
            out_shape=jax.ShapeDtypeStruct((rows, D), act.dtype),
            grid_spec=pltpu.PrefetchScalarGridSpec(
                num_scalar_prefetch=0,
                grid=grid,
                in_specs=in_specs,
                out_specs=pl.BlockSpec((tile_rows, D), lambda i: (i, 0)),
            ),
            compiler_params=pltpu.CompilerParams(
                dimension_semantics=("parallel",),
                vmem_limit_bytes=vmem_limit),
            cost_estimate=cost,
        )(act2, mask2, gamma2, beta2, w1c, b1_2, w2c, b2_2)

    try:
        out = _run(True)       # single-buffered resident weights/biases
    except Exception:
        out = _run(False)      # fallback: default double buffering

    return out.reshape(B, S, D)


def _reference(act, mask, params, eps=1e-5):
    cdt = act.dtype
    x = act.astype(jnp.float32)
    mean = jnp.mean(x, axis=-1, keepdims=True)
    xc = x - mean
    var = jnp.mean(xc * xc, axis=-1, keepdims=True)
    xn = xc * jax.lax.rsqrt(var + eps)
    xn = (xn * params["gamma"].astype(jnp.float32)
          + params["beta"].astype(jnp.float32)).astype(cdt)
    w1 = params["w1"].astype(cdt)
    w2 = params["w2"].astype(cdt)
    h = jnp.maximum(
        jnp.dot(xn, w1, preferred_element_type=jnp.float32)
        + params["b1"].astype(jnp.float32), 0.0).astype(cdt)
    y = (jnp.dot(h, w2, preferred_element_type=jnp.float32)
         + params["b2"].astype(jnp.float32))
    return (y * mask[..., None].astype(jnp.float32)).astype(cdt)


if __name__ == "__main__":
    # Shapes consistent with Transition.forward: act (B, S, D), mask (B, S).
    B, S, D = 2, 8, 128
    H = 4 * D   # num_intermediate_factor = 4

    key = jax.random.PRNGKey(0)
    ks = jax.random.split(key, 10)
    act = jax.random.normal(ks[0], (B, S, D), dtype=jnp.float32)
    mask = (jax.random.uniform(ks[1], (B, S)) > 0.2).astype(jnp.float32)

    # Synthetic parameters (transition2 is 'final'/zero-init in the module;
    # small random values keep the test non-trivial).
    params = {
        "gamma": 1.0 + 0.1 * jax.random.normal(ks[2], (D,), jnp.float32),
        "beta": 0.05 * jax.random.normal(ks[3], (D,), jnp.float32),
        "w1": jax.random.normal(ks[4], (D, H), jnp.float32) * (2.0 / D) ** 0.5,
        "b1": 0.01 * jax.random.normal(ks[5], (H,), jnp.float32),
        "w2": 0.02 * jax.random.normal(ks[6], (H, D), jnp.float32),
        "b2": 0.01 * jax.random.normal(ks[7], (D,), jnp.float32),
    }

    # 1) f32 correctness, single full block.
    out = jax.block_until_ready(transition_forward(act, mask, params))
    ref = _reference(act, mask, params)
    assert out.shape == (B, S, D)
    assert jnp.allclose(out, ref, atol=2e-4, rtol=2e-4), "f32 mismatch"

    # 2) rows not divisible by the tile: exercises the in-pipeline ragged
    #    last block (masked write-back), no wrapper pad/slice.
    B2, S2 = 3, 5
    act_b = jax.random.normal(ks[8], (B2, S2, D), dtype=jnp.float32)
    mask_b = (jax.random.uniform(ks[9], (B2, S2)) > 0.2).astype(jnp.float32)
    out_b = jax.block_until_ready(
        transition_forward(act_b, mask_b, params, tile_rows=8))
    ref_b = _reference(act_b, mask_b, params)
    assert out_b.shape == (B2, S2, D)
    assert jnp.allclose(out_b, ref_b, atol=2e-4, rtol=2e-4), "ragged mismatch"

    # 3) bf16 activations -> bf16 MXU matmuls with f32 accumulation.
    act_h = act.astype(jnp.bfloat16)
    out_h = jax.block_until_ready(transition_forward(act_h, mask, params))
    ref_h = _reference(act_h, mask, params)
    assert out_h.dtype == jnp.bfloat16
    assert jnp.allclose(out_h.astype(jnp.float32), ref_h.astype(jnp.float32),
                        atol=3e-2, rtol=3e-2), "bf16 mismatch"

    # 4) folded LN affine (gamma/beta folded into w1/b1).
    out_f = jax.block_until_ready(
        transition_forward(act, mask, params, fold_ln_affine=True))
    assert jnp.allclose(out_f, ref, atol=1e-3, rtol=1e-3), "folded mismatch"

    print("KERNEL_OK")
</pallas_src>

<mosaic_0001>
module attributes {stable_mosaic.version = 11 : i64} {
  func.func @_transition_kernel(%arg0: i32, %arg1: memref<16x128xf32, #tpu.memory_space<vmem>>, %arg2: memref<16x1xf32, #tpu.memory_space<vmem>>, %arg3: memref<1x128xf32, #tpu.memory_space<vmem>>, %arg4: memref<1x128xf32, #tpu.memory_space<vmem>>, %arg5: memref<128x512xf32, #tpu.memory_space<vmem>>, %arg6: memref<1x512xf32, #tpu.memory_space<vmem>>, %arg7: memref<512x128xf32, #tpu.memory_space<vmem>>, %arg8: memref<1x128xf32, #tpu.memory_space<vmem>>, %arg9: memref<16x128xf32, #tpu.memory_space<vmem>>) attributes {dimension_semantics = [#tpu.dimension_semantics<parallel>], iteration_bounds = array<i64: 1>, scalar_prefetch = 0 : i64, scratch_operands = 0 : i64, tpu.core_type = #tpu.core_type<tc>, window_params = [{transform_indices = @transform_0, window_bounds = array<i64: 16, 128>}, {transform_indices = @transform_1, window_bounds = array<i64: 16, 1>}, {pipeline_mode = #tpu.pipeline_mode<synchronous>, transform_indices = @transform_2, window_bounds = array<i64: 1, 128>}, {pipeline_mode = #tpu.pipeline_mode<synchronous>, transform_indices = @transform_3, window_bounds = array<i64: 1, 128>}, {pipeline_mode = #tpu.pipeline_mode<synchronous>, transform_indices = @transform_4, window_bounds = array<i64: 128, 512>}, {pipeline_mode = #tpu.pipeline_mode<synchronous>, transform_indices = @transform_5, window_bounds = array<i64: 1, 512>}, {pipeline_mode = #tpu.pipeline_mode<synchronous>, transform_indices = @transform_6, window_bounds = array<i64: 512, 128>}, {pipeline_mode = #tpu.pipeline_mode<synchronous>, transform_indices = @transform_7, window_bounds = array<i64: 1, 128>}, {transform_indices = @transform_8, window_bounds = array<i64: 16, 128>}]} {
    %c0 = arith.constant 0 : index
    %c0_0 = arith.constant 0 : index
    %0 = vector.load %arg1[%c0, %c0_0] : memref<16x128xf32, #tpu.memory_space<vmem>>, vector<16x128xf32>
    %cst = arith.constant dense<0.000000e+00> : vector<16xf32>
    %1 = vector.multi_reduction <add>, %0, %cst [1] : vector<16x128xf32> to vector<16xf32>
    %2 = vector.shape_cast %1 : vector<16xf32> to vector<16x1xf32>
    %cst_1 = arith.constant 1.280000e+02 : f32
    %3 = vector.broadcast %cst_1 : f32 to vector<16x1xf32>
    %4 = arith.divf %2, %3 : vector<16x1xf32>
    %5 = vector.broadcast %4 : vector<16x1xf32> to vector<16x128xf32>
    %6 = arith.subf %0, %5 : vector<16x128xf32>
    %7 = arith.mulf %6, %6 : vector<16x128xf32>
    %cst_2 = arith.constant dense<0.000000e+00> : vector<16xf32>
    %8 = vector.multi_reduction <add>, %7, %cst_2 [1] : vector<16x128xf32> to vector<16xf32>
    %9 = vector.shape_cast %8 : vector<16xf32> to vector<16x1xf32>
    %cst_3 = arith.constant 1.280000e+02 : f32
    %10 = vector.broadcast %cst_3 : f32 to vector<16x1xf32>
    %11 = arith.divf %9, %10 : vector<16x1xf32>
    %cst_4 = arith.constant 9.99999974E-6 : f32
    %12 = vector.broadcast %cst_4 : f32 to vector<16x1xf32>
    %13 = arith.addf %11, %12 : vector<16x1xf32>
    %14 = math.rsqrt %13 : vector<16x1xf32>
    %15 = vector.broadcast %14 : vector<16x1xf32> to vector<16x128xf32>
    %16 = arith.mulf %6, %15 : vector<16x128xf32>
    %c0_5 = arith.constant 0 : index
    %c0_6 = arith.constant 0 : index
    %17 = vector.load %arg3[%c0_5, %c0_6] : memref<1x128xf32, #tpu.memory_space<vmem>>, vector<1x128xf32>
    %18 = vector.broadcast %17 : vector<1x128xf32> to vector<16x128xf32>
    %19 = arith.mulf %16, %18 : vector<16x128xf32>
    %c0_7 = arith.constant 0 : index
    %c0_8 = arith.constant 0 : index
    %20 = vector.load %arg4[%c0_7, %c0_8] : memref<1x128xf32, #tpu.memory_space<vmem>>, vector<1x128xf32>
    %21 = vector.broadcast %20 : vector<1x128xf32> to vector<16x128xf32>
    %22 = arith.addf %19, %21 : vector<16x128xf32>
    %c0_9 = arith.constant 0 : index
    %c0_10 = arith.constant 0 : index
    %23 = vector.load %arg5[%c0_9, %c0_10] : memref<128x512xf32, #tpu.memory_space<vmem>>, vector<128x512xf32>
    %cst_11 = arith.constant dense<0.000000e+00> : vector<16x512xf32>
    %24 = tpu.matmul %22, %23, %cst_11 {dimension_numbers = #tpu.dot_dimension_numbers<[1], [0], [0], [1], [0, 0, 1, 1], [], []>} : vector<16x128xf32>, vector<128x512xf32>, vector<16x512xf32> -> vector<16x512xf32>
    %c0_12 = arith.constant 0 : index
    %c0_13 = arith.constant 0 : index
    %25 = vector.load %arg6[%c0_12, %c0_13] : memref<1x512xf32, #tpu.memory_space<vmem>>, vector<1x512xf32>
    %26 = vector.broadcast %25 : vector<1x512xf32> to vector<16x512xf32>
    %27 = arith.addf %24, %26 : vector<16x512xf32>
    %cst_14 = arith.constant 0.000000e+00 : f32
    %28 = vector.broadcast %cst_14 : f32 to vector<16x512xf32>
    %29 = arith.maximumf %27, %28 : vector<16x512xf32>
    %c0_15 = arith.constant 0 : index
    %c0_16 = arith.constant 0 : index
    %30 = vector.load %arg7[%c0_15, %c0_16] : memref<512x128xf32, #tpu.memory_space<vmem>>, vector<512x128xf32>
    %cst_17 = arith.constant dense<0.000000e+00> : vector<16x128xf32>
    %31 = tpu.matmul %29, %30, %cst_17 {dimension_numbers = #tpu.dot_dimension_numbers<[1], [0], [0], [1], [0, 0, 1, 1], [], []>} : vector<16x512xf32>, vector<512x128xf32>, vector<16x128xf32> -> vector<16x128xf32>
    %c0_18 = arith.constant 0 : index
    %c0_19 = arith.constant 0 : index
    %32 = vector.load %arg8[%c0_18, %c0_19] : memref<1x128xf32, #tpu.memory_space<vmem>>, vector<1x128xf32>
    %33 = vector.broadcast %32 : vector<1x128xf32> to vector<16x128xf32>
    %34 = arith.addf %31, %33 : vector<16x128xf32>
    %c0_20 = arith.constant 0 : index
    %c0_21 = arith.constant 0 : index
    %35 = vector.load %arg2[%c0_20, %c0_21] : memref<16x1xf32, #tpu.memory_space<vmem>>, vector<16x1xf32>
    %36 = vector.broadcast %35 : vector<16x1xf32> to vector<16x128xf32>
    %37 = arith.mulf %34, %36 : vector<16x128xf32>
    %c0_22 = arith.constant 0 : index
    %c0_23 = arith.constant 0 : index
    %38 = vector.load %arg9[%c0_22, %c0_23] : memref<16x128xf32, #tpu.memory_space<vmem>>, vector<16x128xf32>
    tpu.vector_store %arg9[%c0_22, %c0_23], %37 {strides = array<i32>} : memref<16x128xf32, #tpu.memory_space<vmem>>, vector<16x128xf32>,
    return
  }
  func.func @transform_0(%arg0: i32) -> (i32, i32) {
    %c0_i32 = arith.constant 0 : i32
    %c0_i32_0 = arith.constant 0 : i32
    return %arg0, %c0_i32 : i32, i32
  }
  func.func @transform_1(%arg0: i32) -> (i32, i32) {
    %c0_i32 = arith.constant 0 : i32
    %c0_i32_0 = arith.constant 0 : i32
    return %arg0, %c0_i32 : i32, i32
  }
  func.func @transform_2(%arg0: i32) -> (i32, i32) {
    %c0_i32 = arith.constant 0 : i32
    %c0_i32_0 = arith.constant 0 : i32
    %c0_i32_1 = arith.constant 0 : i32
    return %c0_i32, %c0_i32_0 : i32, i32
  }
  func.func @transform_3(%arg0: i32) -> (i32, i32) {
    %c0_i32 = arith.constant 0 : i32
    %c0_i32_0 = arith.constant 0 : i32
    %c0_i32_1 = arith.constant 0 : i32
    return %c0_i32, %c0_i32_0 : i32, i32
  }
  func.func @transform_4(%arg0: i32) -> (i32, i32) {
    %c0_i32 = arith.constant 0 : i32
    %c0_i32_0 = arith.constant 0 : i32
    %c0_i32_1 = arith.constant 0 : i32
    return %c0_i32, %c0_i32_0 : i32, i32
  }
  func.func @transform_5(%arg0: i32) -> (i32, i32) {
    %c0_i32 = arith.constant 0 : i32
    %c0_i32_0 = arith.constant 0 : i32
    %c0_i32_1 = arith.constant 0 : i32
    return %c0_i32, %c0_i32_0 : i32, i32
  }
  func.func @transform_6(%arg0: i32) -> (i32, i32) {
    %c0_i32 = arith.constant 0 : i32
    %c0_i32_0 = arith.constant 0 : i32
    %c0_i32_1 = arith.constant 0 : i32
    return %c0_i32, %c0_i32_0 : i32, i32
  }
  func.func @transform_7(%arg0: i32) -> (i32, i32) {
    %c0_i32 = arith.constant 0 : i32
    %c0_i32_0 = arith.constant 0 : i32
    %c0_i32_1 = arith.constant 0 : i32
    return %c0_i32, %c0_i32_0 : i32, i32
  }
  func.func @transform_8(%arg0: i32) -> (i32, i32) {
    %c0_i32 = arith.constant 0 : i32
    %c0_i32_0 = arith.constant 0 : i32
    return %arg0, %c0_i32 : i32, i32
  }
}

module attributes {stable_mosaic.version = 11 : i64} {
  func.func @_transition_kernel(%arg0: i32, %arg1: memref<16x128xf32, #tpu.memory_space<vmem>>, %arg2: memref<16x1xf32, #tpu.memory_space<vmem>>, %arg3: memref<1x128xf32, #tpu.memory_space<vmem>>, %arg4: memref<1x128xf32, #tpu.memory_space<vmem>>, %arg5: memref<128x512xf32, #tpu.memory_space<vmem>>, %arg6: memref<1x512xf32, #tpu.memory_space<vmem>>, %arg7: memref<512x128xf32, #tpu.memory_space<vmem>>, %arg8: memref<1x128xf32, #tpu.memory_space<vmem>>, %arg9: memref<16x128xf32, #tpu.memory_space<vmem>>) attributes {dimension_semantics = [#tpu.dimension_semantics<parallel>], iteration_bounds = array<i64: 1>, scalar_prefetch = 0 : i64, scratch_operands = 0 : i64, tpu.core_type = #tpu.core_type<tc>, window_params = [{transform_indices = @transform_0, window_bounds = array<i64: 16, 128>}, {transform_indices = @transform_1, window_bounds = array<i64: 16, 1>}, {pipeline_mode = #tpu.pipeline_mode<synchronous>, transform_indices = @transform_2, window_bounds = array<i64: 1, 128>}, {pipeline_mode = #tpu.pipeline_mode<synchronous>, transform_indices = @transform_3, window_bounds = array<i64: 1, 128>}, {pipeline_mode = #tpu.pipeline_mode<synchronous>, transform_indices = @transform_4, window_bounds = array<i64: 128, 512>}, {pipeline_mode = #tpu.pipeline_mode<synchronous>, transform_indices = @transform_5, window_bounds = array<i64: 1, 512>}, {pipeline_mode = #tpu.pipeline_mode<synchronous>, transform_indices = @transform_6, window_bounds = array<i64: 512, 128>}, {pipeline_mode = #tpu.pipeline_mode<synchronous>, transform_indices = @transform_7, window_bounds = array<i64: 1, 128>}, {transform_indices = @transform_8, window_bounds = array<i64: 16, 128>}]} {
    %c0 = arith.constant 0 : index
    %c0_0 = arith.constant 0 : index
    %0 = vector.load %arg1[%c0, %c0_0] : memref<16x128xf32, #tpu.memory_space<vmem>>, vector<16x128xf32>
    %cst = arith.constant dense<0.000000e+00> : vector<16xf32>
    %1 = vector.multi_reduction <add>, %0, %cst [1] : vector<16x128xf32> to vector<16xf32>
    %2 = vector.shape_cast %1 : vector<16xf32> to vector<16x1xf32>
    %cst_1 = arith.constant 1.280000e+02 : f32
    %3 = vector.broadcast %cst_1 : f32 to vector<16x1xf32>
    %4 = arith.divf %2, %3 : vector<16x1xf32>
    %5 = vector.broadcast %4 : vector<16x1xf32> to vector<16x128xf32>
    %6 = arith.subf %0, %5 : vector<16x128xf32>
    %7 = arith.mulf %6, %6 : vector<16x128xf32>
    %cst_2 = arith.constant dense<0.000000e+00> : vector<16xf32>
    %8 = vector.multi_reduction <add>, %7, %cst_2 [1] : vector<16x128xf32> to vector<16xf32>
    %9 = vector.shape_cast %8 : vector<16xf32> to vector<16x1xf32>
    %cst_3 = arith.constant 1.280000e+02 : f32
    %10 = vector.broadcast %cst_3 : f32 to vector<16x1xf32>
    %11 = arith.divf %9, %10 : vector<16x1xf32>
    %cst_4 = arith.constant 9.99999974E-6 : f32
    %12 = vector.broadcast %cst_4 : f32 to vector<16x1xf32>
    %13 = arith.addf %11, %12 : vector<16x1xf32>
    %14 = math.rsqrt %13 : vector<16x1xf32>
    %15 = vector.broadcast %14 : vector<16x1xf32> to vector<16x128xf32>
    %16 = arith.mulf %6, %15 : vector<16x128xf32>
    %c0_5 = arith.constant 0 : index
    %c0_6 = arith.constant 0 : index
    %17 = vector.load %arg3[%c0_5, %c0_6] : memref<1x128xf32, #tpu.memory_space<vmem>>, vector<1x128xf32>
    %18 = vector.broadcast %17 : vector<1x128xf32> to vector<16x128xf32>
    %19 = arith.mulf %16, %18 : vector<16x128xf32>
    %c0_7 = arith.constant 0 : index
    %c0_8 = arith.constant 0 : index
    %20 = vector.load %arg4[%c0_7, %c0_8] : memref<1x128xf32, #tpu.memory_space<vmem>>, vector<1x128xf32>
    %21 = vector.broadcast %20 : vector<1x128xf32> to vector<16x128xf32>
    %22 = arith.addf %19, %21 : vector<16x128xf32>
    %c0_9 = arith.constant 0 : index
    %c0_10 = arith.constant 0 : index
    %23 = vector.load %arg5[%c0_9, %c0_10] : memref<128x512xf32, #tpu.memory_space<vmem>>, vector<128x512xf32>
    %cst_11 = arith.constant dense<0.000000e+00> : vector<16x512xf32>
    %24 = tpu.matmul %22, %23, %cst_11 {dimension_numbers = #tpu.dot_dimension_numbers<[1], [0], [0], [1], [0, 0, 1, 1], [], []>} : vector<16x128xf32>, vector<128x512xf32>, vector<16x512xf32> -> vector<16x512xf32>
    %c0_12 = arith.constant 0 : index
    %c0_13 = arith.constant 0 : index
    %25 = vector.load %arg6[%c0_12, %c0_13] : memref<1x512xf32, #tpu.memory_space<vmem>>, vector<1x512xf32>
    %26 = vector.broadcast %25 : vector<1x512xf32> to vector<16x512xf32>
    %27 = arith.addf %24, %26 : vector<16x512xf32>
    %cst_14 = arith.constant 0.000000e+00 : f32
    %28 = vector.broadcast %cst_14 : f32 to vector<16x512xf32>
    %29 = arith.maximumf %27, %28 : vector<16x512xf32>
    %c0_15 = arith.constant 0 : index
    %c0_16 = arith.constant 0 : index
    %30 = vector.load %arg7[%c0_15, %c0_16] : memref<512x128xf32, #tpu.memory_space<vmem>>, vector<512x128xf32>
    %cst_17 = arith.constant dense<0.000000e+00> : vector<16x128xf32>
    %31 = tpu.matmul %29, %30, %cst_17 {dimension_numbers = #tpu.dot_dimension_numbers<[1], [0], [0], [1], [0, 0, 1, 1], [], []>} : vector<16x512xf32>, vector<512x128xf32>, vector<16x128xf32> -> vector<16x128xf32>
    %c0_18 = arith.constant 0 : index
    %c0_19 = arith.constant 0 : index
    %32 = vector.load %arg8[%c0_18, %c0_19] : memref<1x128xf32, #tpu.memory_space<vmem>>, vector<1x128xf32>
    %33 = vector.broadcast %32 : vector<1x128xf32> to vector<16x128xf32>
    %34 = arith.addf %31, %33 : vector<16x128xf32>
    %c0_20 = arith.constant 0 : index
    %c0_21 = arith.constant 0 : index
    %35 = vector.load %arg2[%c0_20, %c0_21] : memref<16x1xf32, #tpu.memory_space<vmem>>, vector<16x1xf32>
    %36 = vector.broadcast %35 : vector<16x1xf32> to vector<16x128xf32>
    %37 = arith.mulf %34, %36 : vector<16x128xf32>
    %c0_22 = arith.constant 0 : index
    %c0_23 = arith.constant 0 : index
    %38 = vector.load %arg9[%c0_22, %c0_23] : memref<16x128xf32, #tpu.memory_space<vmem>>, vector<16x128xf32>
    tpu.vector_store %arg9[%c0_22, %c0_23], %37 {strides = array<i32>} : memref<16x128xf32, #tpu.memory_space<vmem>>, vector<16x128xf32>,
    return
  }
  func.func @transform_0(%arg0: i32) -> (i32, i32) {
    %c0_i32 = arith.constant 0 : i32
    %c0_i32_0 = arith.constant 0 : i32
    return %arg0, %c0_i32 : i32, i32
  }
  func.func @transform_1(%arg0: i32) -> (i32, i32) {
    %c0_i32 = arith.constant 0 : i32
    %c0_i32_0 = arith.constant 0 : i32
    return %arg0, %c0_i32 : i32, i32
  }
  func.func @transform_2(%arg0: i32) -> (i32, i32) {
    %c0_i32 = arith.constant 0 : i32
    %c0_i32_0 = arith.constant 0 : i32
    %c0_i32_1 = arith.constant 0 : i32
    return %c0_i32, %c0_i32_0 : i32, i32
  }
  func.func @transform_3(%arg0: i32) -> (i32, i32) {
    %c0_i32 = arith.constant 0 : i32
    %c0_i32_0 = arith.constant 0 : i32
    %c0_i32_1 = arith.constant 0 : i32
    return %c0_i32, %c0_i32_0 : i32, i32
  }
  func.func @transform_4(%arg0: i32) -> (i32, i32) {
    %c0_i32 = arith.constant 0 : i32
    %c0_i32_0 = arith.constant 0 : i32
    %c0_i32_1 = arith.constant 0 : i32
    return %c0_i32, %c0_i32_0 : i32, i32
  }
  func.func @transform_5(%arg0: i32) -> (i32, i32) {
    %c0_i32 = arith.constant 0 : i32
    %c0_i32_0 = arith.constant 0 : i32
    %c0_i32_1 = arith.constant 0 : i32
    return %c0_i32, %c0_i32_0 : i32, i32
  }
  func.func @transform_6(%arg0: i32) -> (i32, i32) {
    %c0_i32 = arith.constant 0 : i32
    %c0_i32_0 = arith.constant 0 : i32
    %c0_i32_1 = arith.constant 0 : i32
    return %c0_i32, %c0_i32_0 : i32, i32
  }
  func.func @transform_7(%arg0: i32) -> (i32, i32) {
    %c0_i32 = arith.constant 0 : i32
    %c0_i32_0 = arith.constant 0 : i32
    %c0_i32_1 = arith.constant 0 : i32
    return %c0_i32, %c0_i32_0 : i32, i32
  }
  func.func @transform_8(%arg0: i32) -> (i32, i32) {
    %c0_i32 = arith.constant 0 : i32
    %c0_i32_0 = arith.constant 0 : i32
    return %arg0, %c0_i32 : i32, i32
  }
}

</mosaic_0001>

<bundles_post_ra>
// kernel: tpu_custom_call.1
= control target key start
LH: loop header
LB: loop body
LE: loop exit
PB: predicated region body
PF: predicated region fallthrough
CT: control target
= control target key end

     0   :  { %13 = vsyncpa [#allocation3], 0  ;;  %s1032_s0 = inlined_call_operand.vmem [shape: f32[16,128], index: 0, kind: input, shape index: {}]   ;;  %s1033_s1 = inlined_call_operand.vmem [shape: f32[16,1], index: 1, kind: input, shape index: {}]   ;;  %s1034_s2 = inlined_call_operand.vmem [shape: f32[1,128], index: 2, kind: input, shape index: {}]   ;;  %s1035_s3 = inlined_call_operand.vmem [shape: f32[1,128], index: 3, kind: input, shape index: {}]   ;;  %s1036_s4 = inlined_call_operand.hbm [shape: f32[128,512], index: 4, kind: input, shape index: {}]   ;;  %s1037_s5 = inlined_call_operand.vmem [shape: f32[1,512], index: 5, kind: input, shape index: {}]   ;;  %s1038_s6 = inlined_call_operand.hbm [shape: f32[512,128], index: 6, kind: input, shape index: {}]   ;;  %s1039_s7 = inlined_call_operand.vmem [shape: f32[1,128], index: 7, kind: input, shape index: {}]   ;;  %s1040_s8 = inlined_call_operand.hbm [shape: f32[16,128], index: 8, kind: output, shape index: {}]  }
   0x1   :  { %14 = vsyncpa [#allocation6], 0 }
   0x2   :  { %15 = vsyncpa [#allocation4], 0  ;;  %s898_s27 = smov [#allocation2]   ;;  %s826_s9 = scalar_lea.hbm %s1036_s4, 8192 }
   0x3   :  { %s29_s28 = sshll.u32 %s898_s27, 4  ;;  %p827_p0 = scmp.ne.s32.totalorder %s1036_s4, %s826_s9  ;;  %s30_s28 = int_to_ptr.vmem [resolvable:$true] %s29_s28 }
   0x4   :  { %p830_p1 = scmp.lt.u32.totalorder %s826_s9, %s1036_s4 }
   0x6   :  { %p832_p2 = pnand %p830_p1, %p827_p0 }
   0x8   :  { %835 = shalt.err (!%p832_p2)
}
   0x9   :  { %s836_s14 = scalar_lea.vmem %s30_s28, 8192  ;;  %p841_p4 = scmp.lt.s32.totalorder %s30_s28, %s30_s28 }
   0xa   :  { %p837_p3 = scmp.ne.s32.totalorder %s30_s28, %s836_s14  ;;  %p842_p5 = scmp.lt.s32.totalorder %s836_s14, %s836_s14 }
   0xc   :  { %p843_p6 = por %p842_p5, %p841_p4 }
   0xe   :  { %p844_p7 = pnand %p843_p6, %p837_p3 }
  0x10   :  { %847 = shalt.err (!%p844_p7)
}
  0x11   :  { %s899_s15 = smov 512   ;;  %s900_s16 = smov 32  }
  0x12   :  { %35 = dma.hbm_to_vmem [thread:$0]  %s1036_s4, 8192, %s30_s28, [#allocation3], %s899_s15, %s899_s15, %s900_s16  }
  0x13   :  { %s901_s19 = smov [#allocation5]   ;;  %s848_s23 = scalar_lea.hbm %s1038_s6, 8192 }
  0x14   :  { %s43_s20 = sshll.u32 %s901_s19, 4  ;;  %p849_p8 = scmp.ne.s32.totalorder %s1038_s6, %s848_s23  ;;  %s44_s20 = int_to_ptr.vmem [resolvable:$true] %s43_s20 }
  0x15   :  { %p852_p9 = scmp.lt.u32.totalorder %s848_s23, %s1038_s6 }
  0x17   :  { %p854_p10 = pnand %p852_p9, %p849_p8 }
  0x19   :  { %857 = shalt.err (!%p854_p10)
}
  0x1a   :  { %s858_s29 = scalar_lea.vmem %s44_s20, 8192  ;;  %p863_p12 = scmp.lt.s32.totalorder %s44_s20, %s44_s20 }
  0x1b   :  { %p859_p11 = scmp.ne.s32.totalorder %s44_s20, %s858_s29  ;;  %p864_p13 = scmp.lt.s32.totalorder %s858_s29, %s858_s29 }
  0x1d   :  { %p865_p0 = por %p864_p13, %p863_p12 }
  0x1f   :  { %p866_p1 = pnand %p865_p0, %p859_p11 }
  0x21   :  { %869 = shalt.err (!%p866_p1)
}
  0x22   :  { %s902_s4 = smov 128   ;;  %s903_s28 = smov 8  }
  0x23   :  { %49 = dma.hbm_to_vmem [thread:$0]  %s1038_s6, 8192, %s44_s20, [#allocation6], %s902_s4, %s902_s4, %s903_s28  }
  0x24   :  { %892 = dma.done.wait [#allocation3], 8192  }
  0x25   :  { %893 = vsyncadd [#allocation3], 4294959104 }
  0x26   :  { %894 = dma.done.wait [#allocation6], 8192  }
  0x27   :  { %895 = vsyncadd [#allocation6], 4294959104  ;;  %v58_v0 = vld [vmem:[%s1032_s0] sm:$0xff]  ;;  %v59_v1 = vld [vmem:[%s1032_s0 + $0x8] sm:$0xff]  ;;  %s906_s20 = smov [#allocation7]  }
  0x28   :  { %60 = vadd.xlane.f32.xlu0 %v58_v0  ;;  %v102_v2 = vld [vmem:[#allocation2 + $0x8] sm:$0xff]  ;;  %v104_v4 = vld [vmem:[#allocation2 + $0x18] sm:$0xff]  ;;  %v101_v7 = vld [vmem:[#allocation2] sm:$0xff]  ;;  %s591_s21 = sshll.u32 %s906_s20, 4  ;;  %s592_s21 = int_to_ptr.vmem [resolvable:$true] %s591_s21 }
  0x29   :  { %v106_v3 = vld [vmem:[#allocation2 + $0x28] sm:$0xff]  ;;  %v108_v6 = vld [vmem:[#allocation2 + $0x38] sm:$0xff]  ;;  %v105_v8 = vld [vmem:[#allocation2 + $0x20] sm:$0xff]  ;;  %p875_p3 = scmp.lt.s32.totalorder %s592_s21, %s592_s21 }
  0x2a   :  { %v683_v5 = vpack.c.bf16 %v106_v3, %v102_v2  ;;  %v715_v9 = vpack.c.bf16 %v108_v6, %v104_v4  ;;  %v685_v10 = vpack.c.bf16 %v105_v8, %v101_v7  ;;  %v103_v11 = vld [vmem:[#allocation2 + $0x10] sm:$0xff]  ;;  %v110_v13 = vld [vmem:[#allocation2 + $0x48] sm:$0xff]  ;;  %v112_v16 = vld [vmem:[#allocation2 + $0x58] sm:$0xff] }
  0x2b   :  { %v107_v12 = vld [vmem:[#allocation2 + $0x30] sm:$0xff]  ;;  %v114_v15 = vld [vmem:[#allocation2 + $0x68] sm:$0xff]  ;;  %v116_v17 = vld [vmem:[#allocation2 + $0x78] sm:$0xff] }
  0x2c   :  { %62 = vadd.xlane.f32.xlu0 %v59_v1  ;;  %684 = vmatprep.subr.bf16.mxu0 %v683_v5  ;;  %v717_v14 = vpack.c.bf16 %v107_v12, %v103_v11  ;;  %v687_v18 = vpack.c.bf16 %v114_v15, %v110_v13  ;;  %v719_v19 = vpack.c.bf16 %v116_v17, %v112_v16  ;;  %v109_v20 = vld [vmem:[#allocation2 + $0x40] sm:$0xff]  ;;  %v111_v22 = vld [vmem:[#allocation2 + $0x50] sm:$0xff]  ;;  %v118_v25 = vld [vmem:[#allocation2 + $0x88] sm:$0xff] }
  0x2d   :  { %716 = vmatprep.subr.bf16.mxu1 %v715_v9  ;;  %686 = vmatpush1.bf16.msra.mxu0 %v685_v10  ;;  %v113_v21 = vld [vmem:[#allocation2 + $0x60] sm:$0xff]  ;;  %v115_v24 = vld [vmem:[#allocation2 + $0x70] sm:$0xff]  ;;  %v122_v26 = vld [vmem:[#allocation2 + $0xa8] sm:$0xff] }
  0x2e   :  { %718 = vmatpush1.bf16.msra.mxu1 %v717_v14  ;;  %v689_v23 = vpack.c.bf16 %v113_v21, %v109_v20  ;;  %688 = vmatprep.subr.bf16.mxu0 %v687_v18  ;;  %v721_v27 = vpack.c.bf16 %v115_v24, %v111_v22  ;;  %v691_v28 = vpack.c.bf16 %v122_v26, %v118_v25  ;;  %v120_v29 = vld [vmem:[#allocation2 + $0x98] sm:$0xff]  ;;  %v117_v31 = vld [vmem:[#allocation2 + $0x80] sm:$0xff]  ;;  %v119_v34 = vld [vmem:[#allocation2 + $0x90] sm:$0xff]  ;;  %v904_v22 = vmov 0.0  }
  0x2f   :  { %720 = vmatprep.subr.bf16.mxu1 %v719_v19  ;;  %v124_v30 = vld [vmem:[#allocation2 + $0xb8] sm:$0xff]  ;;  %v121_v33 = vld [vmem:[#allocation2 + $0xa0] sm:$0xff]  ;;  %v123_v35 = vld [vmem:[#allocation2 + $0xb0] sm:$0xff]  ;;  %251 = vmatprep.mubr.f32.mxu0 %v904_v22 }
  0x30   :  { %v723_v32 = vpack.c.bf16 %v124_v30, %v120_v29  ;;  %v693_v36 = vpack.c.bf16 %v121_v33, %v117_v31  ;;  %v725_v37 = vpack.c.bf16 %v123_v35, %v119_v34  ;;  %v126_v46 = vld [vmem:[#allocation2 + $0xc8] sm:$0xff]  ;;  %v128_v48 = vld [vmem:[#allocation2 + $0xd8] sm:$0xff]  ;;  %v125_v51 = vld [vmem:[#allocation2 + $0xc0] sm:$0xff]  ;;  %328 = vmatprep.mubr.f32.mxu1 %v904_v22 }
  0x31   :  { %690 = vmatpush1.bf16.msra.mxu0 %v689_v23  ;;  %v130_v47 = vld [vmem:[#allocation2 + $0xe8] sm:$0xff]  ;;  %v132_v50 = vld [vmem:[#allocation2 + $0xf8] sm:$0xff]  ;;  %v129_v52 = vld [vmem:[#allocation2 + $0xe0] sm:$0xff] }
  0x32   :  { %722 = vmatpush1.bf16.msra.mxu1 %v721_v27  ;;  %692 = vmatprep.subr.bf16.mxu0 %v691_v28  ;;  %v695_v49 = vpack.c.bf16 %v130_v47, %v126_v46  ;;  %v727_v53 = vpack.c.bf16 %v132_v50, %v128_v48  ;;  %v697_v54 = vpack.c.bf16 %v129_v52, %v125_v51  ;;  %v127_v55 = vld [vmem:[#allocation2 + $0xd0] sm:$0xff]  ;;  %v134_v58 = vld [vmem:[#allocation2 + $0x108] sm:$0xff]  ;;  %v136_v60 = vld [vmem:[#allocation2 + $0x118] sm:$0xff] }
  0x33   :  { %724 = vmatprep.subr.bf16.mxu1 %v723_v32  ;;  %v131_v56 = vld [vmem:[#allocation2 + $0xf0] sm:$0xff]  ;;  %v138_v59 = vld [vmem:[#allocation2 + $0x128] sm:$0xff]  ;;  %v140_v62 = vld [vmem:[#allocation2 + $0x138] sm:$0xff] }
  0x34   :  { %v729_v57 = vpack.c.bf16 %v131_v56, %v127_v55  ;;  %v699_v61 = vpack.c.bf16 %v138_v59, %v134_v58  ;;  %v133_v63 = vld [vmem:[#allocation2 + $0x100] sm:$0xff]  ;;  %v135_v3 = vld [vmem:[#allocation2 + $0x110] sm:$0xff]  ;;  %v142_v6 = vld [vmem:[#allocation2 + $0x148] sm:$0xff] }
  0x35   :  { %694 = vmatpush1.bf16.msra.mxu0 %v693_v36  ;;  %v139_v4 = vld [vmem:[#allocation2 + $0x130] sm:$0xff]  ;;  %v146_v7 = vld [vmem:[#allocation2 + $0x168] sm:$0xff]  ;;  %v144_v8 = vld [vmem:[#allocation2 + $0x158] sm:$0xff] }
  0x36   :  { %726 = vmatpush1.bf16.msra.mxu1 %v725_v37  ;;  %696 = vmatprep.subr.bf16.mxu0 %v695_v49  ;;  %v733_v5 = vpack.c.bf16 %v139_v4, %v135_v3  ;;  %v703_v9 = vpack.c.bf16 %v146_v7, %v142_v6  ;;  %v148_v10 = vld [vmem:[#allocation2 + $0x178] sm:$0xff]  ;;  %v141_v11 = vld [vmem:[#allocation2 + $0x140] sm:$0xff]  ;;  %v143_v15 = vld [vmem:[#allocation2 + $0x150] sm:$0xff] }
  0x37   :  { %728 = vmatprep.subr.bf16.mxu1 %v727_v53  ;;  %v145_v12 = vld [vmem:[#allocation2 + $0x160] sm:$0xff]  ;;  %v735_v13 = vpack.c.bf16 %v148_v10, %v144_v8  ;;  %v147_v16 = vld [vmem:[#allocation2 + $0x170] sm:$0xff]  ;;  %v150_v17 = vld [vmem:[#allocation2 + $0x188] sm:$0xff] }
  0x38   :  { %v705_v14 = vpack.c.bf16 %v145_v12, %v141_v11  ;;  %v737_v18 = vpack.c.bf16 %v147_v16, %v143_v15  ;;  %v154_v19 = vld [vmem:[#allocation2 + $0x1a8] sm:$0xff]  ;;  %v152_v20 = vld [vmem:[#allocation2 + $0x198] sm:$0xff]  ;;  %v149_v25 = vld [vmem:[#allocation2 + $0x180] sm:$0xff] }
  0x39   :  { %698 = vmatpush1.bf16.msra.mxu0 %v697_v54  ;;  %v156_v21 = vld [vmem:[#allocation2 + $0x1b8] sm:$0xff]  ;;  %v707_v23 = vpack.c.bf16 %v154_v19, %v150_v17  ;;  %v153_v26 = vld [vmem:[#allocation2 + $0x1a0] sm:$0xff]  ;;  %v151_v27 = vld [vmem:[#allocation2 + $0x190] sm:$0xff] }
  0x3a   :  { %730 = vmatpush1.bf16.msra.mxu1 %v729_v57  ;;  %700 = vmatprep.subr.bf16.mxu0 %v699_v61  ;;  %v739_v24 = vpack.c.bf16 %v156_v21, %v152_v20  ;;  %v709_v28 = vpack.c.bf16 %v153_v26, %v149_v25  ;;  %v155_v29 = vld [vmem:[#allocation2 + $0x1b0] sm:$0xff]  ;;  %v158_v30 = vld [vmem:[#allocation2 + $0x1c8] sm:$0xff]  ;;  %v160_v34 = vld [vmem:[#allocation2 + $0x1d8] sm:$0xff] }
  0x3b   :  { %v162_v31 = vld [vmem:[#allocation2 + $0x1e8] sm:$0xff]  ;;  %v741_v32 = vpack.c.bf16 %v155_v29, %v151_v27  ;;  %v164_v35 = vld [vmem:[#allocation2 + $0x1f8] sm:$0xff]  ;;  %v157_v36 = vld [vmem:[#allocation2 + $0x1c0] sm:$0xff] }
  0x3c   :  { %v711_v33 = vpack.c.bf16 %v162_v31, %v158_v30  ;;  %v743_v37 = vpack.c.bf16 %v164_v35, %v160_v34  ;;  %v366_v46 = vld [vmem:[#allocation5 + $0x88] sm:$0xff]  ;;  %v397_v47 = vld [vmem:[#allocation5 + $0x180] sm:$0xff]  ;;  %v368_v3 = vld [vmem:[#allocation5 + $0x98] sm:$0xff] }
  0x3d   :  { %v398_v49 = vld [vmem:[#allocation5 + $0x188] sm:$0xff]  ;;  %v604_v58 = vld [vmem:[%s1034_s2] ss:$0 sm:$0xff]  ;;  %v399_v4 = vld [vmem:[#allocation5 + $0x190] sm:$0xff] }
  0x3e   :  { %v779_v50 = vpack.c.bf16 %v398_v49, %v397_v47  ;;  %v349_v61 = vld [vmem:[#allocation5] sm:$0xff]  ;;  %v352_v11 = vld [vmem:[#allocation5 + $0x18] sm:$0xff]  ;;  %v402_v20 = vld [vmem:[#allocation5 + $0x1a8] sm:$0xff] }
  0x3f   :  { %v384_v15 = vld [vmem:[#allocation5 + $0x118] sm:$0xff]  ;;  %v369_v16 = vld [vmem:[#allocation5 + $0xa0] sm:$0xff]  ;;  %v354_v25 = vld [vmem:[#allocation5 + $0x28] sm:$0xff] }
  0x40   :  { %v401_v19 = vld [vmem:[#allocation5 + $0x1a0] sm:$0xff]  ;;  %v386_v29 = vld [vmem:[#allocation5 + $0x128] sm:$0xff]  ;;  %v371_v30 = vld [vmem:[#allocation5 + $0xb0] sm:$0xff] }
  0x41   :  { %v787_v27 = vpack.c.bf16 %v402_v20, %v401_v19  ;;  %v372_v31 = vld [vmem:[#allocation5 + $0xb8] sm:$0xff]  ;;  %v355_v35 = vld [vmem:[#allocation5 + $0x30] sm:$0xff]  ;;  %v357_v49 = vld [vmem:[#allocation5 + $0x40] sm:$0xff] }
  0x42   :  { %v412_v20 = vld [vmem:[#allocation5 + $0x1f8] sm:$0xff] }
  0xb5   :  { %v61_v38 = vpop.xlane.xlu0 %60 }
  0xb6   :  { %v65_v39 = vmul.f32 0.0078125, %v61_v38  ;;  %v161_v38 = vld [vmem:[#allocation2 + $0x1e0] sm:$0xff] }
  0xb8   :  { %v985_v40 = vsub.f32 %v58_v0, %v65_v39  ;;  %v137_v0 = vld [vmem:[#allocation2 + $0x120] sm:$0xff]  ;;  %v159_v39 = vld [vmem:[#allocation2 + $0x1d0] sm:$0xff] }
  0xb9   :  { %v63_v41 = vpop.xlane.xlu0 %62  ;;  %v701_v2 = vpack.c.bf16 %v137_v0, %v133_v63  ;;  %v381_v63 = vld [vmem:[#allocation5 + $0x100] sm:$0xff]  ;;  %v382_v0 = vld [vmem:[#allocation5 + $0x108] sm:$0xff] }
  0xba   :  { %v66_v42 = vmul.f32 0.0078125, %v63_v41  ;;  %v69_v43 = vmul.f32 %v985_v40, %v985_v40  ;;  %v163_v41 = vld [vmem:[#allocation2 + $0x1f0] sm:$0xff]  ;;  %v781_v10 = vpack.c.bf16 %v382_v0, %v381_v63 }
  0xbb   :  { %702 = vmatpush1.bf16.msra.mxu0 %v701_v2 }
  0xbc   :  { %v989_v44 = vsub.f32 %v59_v1, %v66_v42  ;;  %71 = vadd.xlane.f32.xlu1 %v69_v43  ;;  %v731_v1 = vpack.c.bf16 %v140_v62, %v136_v60  ;;  %704 = vmatprep.subr.bf16.mxu0 %v703_v9  ;;  %v713_v42 = vpack.c.bf16 %v161_v38, %v157_v36  ;;  %v605_v60 = vld [vmem:[%s1035_s3] ss:$0 sm:$0xff]  ;;  %v350_v62 = vld [vmem:[#allocation5 + $0x8] sm:$0xff]  ;;  %v356_v36 = vld [vmem:[#allocation5 + $0x38] sm:$0xff] }
  0xbd   :  { %v745_v43 = vpack.c.bf16 %v163_v41, %v159_v39  ;;  %v749_v9 = vpack.c.bf16 %v350_v62, %v349_v61  ;;  %v387_v39 = vld [vmem:[#allocation5 + $0x130] sm:$0xff]  ;;  %v388_v41 = vld [vmem:[#allocation5 + $0x138] sm:$0xff]  ;;  %v761_v47 = vpack.c.bf16 %v356_v36, %v355_v35 }
  0xbe   :  { %v70_v45 = vmul.f32 %v989_v44, %v989_v44  ;;  %732 = vmatprep.subr.bf16.mxu1 %v731_v1  ;;  %v367_v1 = vld [vmem:[#allocation5 + $0x90] sm:$0xff]  ;;  %v360_v62 = vld [vmem:[#allocation5 + $0x58] sm:$0xff] }
  0xbf   :  { %734 = vmatpush1.bf16.msra.mxu1 %v733_v5  ;;  %706 = vmatpush1.bf16.msra.mxu0 %v705_v14  ;;  %v400_v5 = vld [vmem:[#allocation5 + $0x198] sm:$0xff]  ;;  %v751_v12 = vpack.c.bf16 %v368_v3, %v367_v1  ;;  %v383_v14 = vld [vmem:[#allocation5 + $0x110] sm:$0xff]  ;;  %v377_v3 = vld [vmem:[#allocation5 + $0xe0] sm:$0xff] }
  0xc0   :  { %73 = vadd.xlane.f32.xlu1 %v70_v45  ;;  %736 = vmatprep.subr.bf16.mxu1 %v735_v13  ;;  %v365_v45 = vld [vmem:[#allocation5 + $0x80] sm:$0xff]  ;;  %v783_v13 = vpack.c.bf16 %v400_v5, %v399_v4  ;;  %v359_v61 = vld [vmem:[#allocation5 + $0x50] sm:$0xff]  ;;  %v378_v4 = vld [vmem:[#allocation5 + $0xe8] sm:$0xff] }
  0xc1   :  { %708 = vmatprep.subr.bf16.mxu0 %v707_v23  ;;  %v747_v48 = vpack.c.bf16 %v366_v46, %v365_v45  ;;  %v785_v23 = vpack.c.bf16 %v384_v15, %v383_v14  ;;  %v405_v45 = vld [vmem:[#allocation5 + $0x1c0] sm:$0xff]  ;;  %v406_v46 = vld [vmem:[#allocation5 + $0x1c8] sm:$0xff]  ;;  %v391_v1 = vld [vmem:[#allocation5 + $0x150] sm:$0xff] }
  0xc2   :  { %v409_v5 = vld [vmem:[#allocation5 + $0x1e0] sm:$0xff]  ;;  %v394_v14 = vld [vmem:[#allocation5 + $0x168] sm:$0xff] }
  0xc3   :  { %738 = vmatpush1.bf16.msra.mxu1 %v737_v18  ;;  %710 = vmatpush1.bf16.msra.mxu0 %v709_v28  ;;  %v370_v18 = vld [vmem:[#allocation5 + $0xa8] sm:$0xff]  ;;  %v385_v28 = vld [vmem:[#allocation5 + $0x120] sm:$0xff] }
  0xc4   :  { %740 = vmatprep.subr.bf16.mxu1 %v739_v24  ;;  %712 = vmatprep.subr.bf16.mxu0 %v711_v33  ;;  %v353_v24 = vld [vmem:[#allocation5 + $0x20] sm:$0xff]  ;;  %v755_v26 = vpack.c.bf16 %v370_v18, %v369_v16  ;;  %v404_v33 = vld [vmem:[#allocation5 + $0x1b8] sm:$0xff]  ;;  %v789_v34 = vpack.c.bf16 %v386_v29, %v385_v28  ;;  %v379_v16 = vld [vmem:[#allocation5 + $0xf0] sm:$0xff] }
  0xc5   :  { %v411_v18 = vld [vmem:[#allocation5 + $0x1f0] sm:$0xff]  ;;  %v570_v28 = vld [vmem:[%s1033_s1] sm:$0xff]  ;;  %v571_v29 = vld [vmem:[%s1033_s1 + $0x8] sm:$0xff] }
  0xc7   :  { %742 = vmatpush1.bf16.msra.mxu1 %v741_v32  ;;  %714 = vmatpush1.bf16.msra.mxu0 %v713_v42  ;;  %v403_v32 = vld [vmem:[#allocation5 + $0x1b0] sm:$0xff]  ;;  %v373_v42 = vld [vmem:[#allocation5 + $0xc0] sm:$0xff] }
  0xc8   :  { %744 = vmatprep.subr.bf16.mxu1 %v743_v37  ;;  %748 = vmatprep.subr.bf16.mxu0 %v747_v48  ;;  %v759_v37 = vpack.c.bf16 %v372_v31, %v371_v30  ;;  %v791_v38 = vpack.c.bf16 %v404_v33, %v403_v32  ;;  %v793_v48 = vpack.c.bf16 %v388_v41, %v387_v39  ;;  %v905_v30 = vmov 0  }
  0xc9   :  { %820 = vset.pattern.permute.xlu0 %v905_v30  ;;  %821 = vset.pattern.permute.xlu1 %v905_v30  ;;  %v167_v31 = vlaneseq }
  0xca   :  { %574 = vperm.xlu0 %820, %v570_v28  }
  0xcb   :  { %746 = vmatpush1.bf16.msra.mxu1 %v745_v43  ;;  %v374_v43 = vld [vmem:[#allocation5 + $0xc8] sm:$0xff]  ;;  %v168_v32 = vshrl.u32 %v167_v31, 7 }
  0xcc   :  { %780 = vmatprep.subr.bf16.mxu1 %v779_v50  ;;  %v358_v50 = vld [vmem:[#allocation5 + $0x48] sm:$0xff] }
  0xcd   :  { %v169_v33 = vsub.s32 0, %v168_v32  ;;  %v173_v35 = vsub.s32 1, %v168_v32  ;;  %v181_v36 = vsub.s32 3, %v168_v32 }
  0xd1   :  { %579 = vperm.xlu1 %821, %v571_v29  }
 0x149   :  { %v72_v51 = vpop.xlane.xlu1 %71 }
 0x14a   :  { %v75_v52 = vmul.f32 0.0078125, %v72_v51  ;;  %v763_v51 = vpack.c.bf16 %v374_v43, %v373_v42 }
 0x14c   :  { %v77_v53 = vadd.f32 1e-05, %v75_v52  ;;  %v795_v52 = vpack.c.bf16 %v406_v46, %v405_v45 }
 0x14d   :  { %v74_v54 = vpop.xlane.xlu1 %73 }
 0x14e   :  { %822 = vrsqrt.f32 %v77_v53  ;;  %v76_v55 = vmul.f32 0.0078125, %v74_v54  ;;  %v389_v53 = vld [vmem:[#allocation5 + $0x140] sm:$0xff]  ;;  %v390_v54 = vld [vmem:[#allocation5 + $0x148] sm:$0xff] }
 0x150   :  { %v78_v56 = vadd.f32 1e-05, %v76_v55  ;;  %v375_v55 = vld [vmem:[#allocation5 + $0xd0] sm:$0xff] }
 0x152   :  { %824 = vrsqrt.f32 %v78_v56  ;;  %v376_v56 = vld [vmem:[#allocation5 + $0xd8] sm:$0xff] }
 0x153   :  { %v767_v63 = vpack.c.bf16 %v376_v56, %v375_v55 }
 0x158   :  { %v823_v57 = vpop.eup %822 }
 0x159   :  { %v81_v59 = vmul.f32 %v823_v57, %v985_v40  ;;  %v351_v40 = vld [vmem:[#allocation5 + $0x10] sm:$0xff] }
 0x15a   :  { %v753_v21 = vpack.c.bf16 %v352_v11, %v351_v40  ;;  %v407_v57 = vld [vmem:[#allocation5 + $0x1d0] sm:$0xff]  ;;  %v361_v40 = vld [vmem:[#allocation5 + $0x60] sm:$0xff]  ;;  %v362_v11 = vld [vmem:[#allocation5 + $0x68] sm:$0xff] }
 0x15b   :  { %v90_v2 = vmul.f32 %v604_v58, %v81_v59  ;;  %v765_v59 = vpack.c.bf16 %v358_v50, %v357_v49 }
 0x15c   :  { %v825_v6 = vpop.eup %824 }
 0x15d   :  { %v99_v7 = vadd.f32 %v605_v60, %v90_v2  ;;  %v82_v8 = vmul.f32 %v825_v6, %v989_v44  ;;  %v392_v2 = vld [vmem:[#allocation5 + $0x158] sm:$0xff]  ;;  %v410_v6 = vld [vmem:[#allocation5 + $0x1e8] sm:$0xff] }
 0x15f   :  { %252 = vmatmul.mubr.f32.vlgmr.msra.gmra.mrb[0].mxu0 %v99_v7  ;;  %329 = vmatmul.mubr.f32.vlgmr.msra.gmra.mrb[0].mxu1 %v99_v7  ;;  %v91_v17 = vmul.f32 %v604_v58, %v82_v8  ;;  %v408_v58 = vld [vmem:[#allocation5 + $0x1d8] sm:$0xff]  ;;  %v769_v7 = vpack.c.bf16 %v360_v62, %v359_v61  ;;  %v801_v8 = vpack.c.bf16 %v392_v2, %v391_v1 }
 0x160   :  { %257 = vmatprep.mubr.f32.mxu0 %v904_v22  ;;  %334 = vmatprep.mubr.f32.mxu1 %v904_v22  ;;  %v757_v22 = vpack.c.bf16 %v354_v25, %v353_v24  ;;  %v799_v0 = vpack.c.bf16 %v408_v58, %v407_v57  ;;  %v395_v25 = vld [vmem:[#allocation5 + $0x170] sm:$0xff] }
 0x161   :  { %v100_v44 = vadd.f32 %v605_v60, %v91_v17  ;;  %750 = vmatpush3.bf16.msra.mxu0 %v749_v9  ;;  %782 = vmatpush3.bf16.msra.mxu1 %v781_v10  ;;  %v797_v60 = vpack.c.bf16 %v390_v54, %v389_v53  ;;  %v771_v9 = vpack.c.bf16 %v378_v4, %v377_v3  ;;  %v380_v17 = vld [vmem:[#allocation5 + $0xf8] sm:$0xff] }
 0x162   :  { %752 = vmatprep.subr.bf16.mxu0 %v751_v12  ;;  %784 = vmatprep.subr.bf16.mxu1 %v783_v13  ;;  %v803_v10 = vpack.c.bf16 %v410_v6, %v409_v5  ;;  %v393_v12 = vld [vmem:[#allocation5 + $0x160] sm:$0xff]  ;;  %v773_v13 = vpack.c.bf16 %v362_v11, %v361_v40  ;;  %v775_v19 = vpack.c.bf16 %v380_v17, %v379_v16 }
 0x163   :  { %258 = vmatmul.mubr.f32.gmra.mrb[2].mxu0 %v100_v44  ;;  %335 = vmatmul.mubr.f32.gmra.mrb[2].mxu1 %v100_v44  ;;  %v805_v15 = vpack.c.bf16 %v394_v14, %v393_v12  ;;  %v363_v44 = vld [vmem:[#allocation5 + $0x70] sm:$0xff]  ;;  %v606_v5 = vld [vmem:[%s1039_s7] ss:$0 sm:$0xff]  ;;  %s870_s7 = scalar_lea.vmem %s592_s21, 256 }
 0x164   :  { %p871_p2 = scmp.ne.s32.totalorder %s592_s21, %s870_s7  ;;  %p876_p4 = scmp.lt.s32.totalorder %s870_s7, %s870_s7 }
 0x165   :  { %754 = vmatpush3.bf16.msra.mxu0 %v753_v21  ;;  %786 = vmatpush3.bf16.msra.mxu1 %v785_v23  ;;  %v364_v21 = vld [vmem:[#allocation5 + $0x78] sm:$0xff]  ;;  %v807_v23 = vpack.c.bf16 %v412_v20, %v411_v18  ;;  %v580_v20 = vpop.permute.xlu1 %579 }
 0x166   :  { %756 = vmatprep.subr.bf16.mxu0 %v755_v26  ;;  %788 = vmatprep.subr.bf16.mxu1 %v787_v27  ;;  %v777_v24 = vpack.c.bf16 %v364_v21, %v363_v44  ;;  %v396_v26 = vld [vmem:[#allocation5 + $0x178] sm:$0xff]  ;;  %p877_p5 = por %p876_p4, %p875_p3 }
 0x167   :  { %v809_v27 = vpack.c.bf16 %v396_v26, %v395_v25 }
 0x168   :  { %p878_p6 = pnand %p877_p5, %p871_p2 }
 0x169   :  { %758 = vmatpush3.bf16.msra.mxu0 %v757_v22  ;;  %790 = vmatpush3.bf16.msra.mxu1 %v789_v34  ;;  %v177_v22 = vsub.s32 2, %v168_v32  ;;  %v165_v34 = vld [vmem:[%s1037_s5] sm:$0xf] }
 0x16a   :  { %760 = vmatprep.subr.bf16.mxu0 %v759_v37  ;;  %792 = vmatprep.subr.bf16.mxu1 %v791_v38  ;;  %v170_v37 = vrot.slane %v165_v34, %v169_v33  ;;  %v174_v39 = vrot.slane %v165_v34, %v173_v35  ;;  %v182_v41 = vrot.slane %v165_v34, %v181_v36 }
 0x16b   :  { %v178_v38 = vrot.slane %v165_v34, %v177_v22 }
 0x16d   :  { %762 = vmatpush3.bf16.msra.mxu0 %v761_v47  ;;  %794 = vmatpush3.bf16.msra.mxu1 %v793_v48 }
 0x16e   :  { %764 = vmatprep.subr.bf16.mxu0 %v763_v51  ;;  %796 = vmatprep.subr.bf16.mxu1 %v795_v52 }
 0x171   :  { %766 = vmatpush3.bf16.msra.mxu0 %v765_v59  ;;  %798 = vmatpush3.bf16.msra.mxu1 %v797_v60 }
 0x172   :  { %768 = vmatprep.subr.bf16.mxu0 %v767_v63  ;;  %800 = vmatprep.subr.bf16.mxu1 %v799_v0 }
 0x175   :  { %770 = vmatpush3.bf16.msra.mxu0 %v769_v7  ;;  %802 = vmatpush3.bf16.msra.mxu1 %v801_v8 }
 0x176   :  { %772 = vmatprep.subr.bf16.mxu0 %v771_v9  ;;  %804 = vmatprep.subr.bf16.mxu1 %v803_v10  ;;  %v575_v10 = vpop.permute.xlu0 %574 }
 0x179   :  { %774 = vmatpush3.bf16.msra.mxu0 %v773_v13  ;;  %806 = vmatpush3.bf16.msra.mxu1 %v805_v15 }
 0x17a   :  { %776 = vmatprep.subr.bf16.mxu0 %v775_v19  ;;  %808 = vmatprep.subr.bf16.mxu1 %v807_v23 }
 0x17d   :  { %778 = vmatpush3.bf16.msra.mxu0 %v777_v24  ;;  %810 = vmatpush3.bf16.msra.mxu1 %v809_v27 }
 0x232   :  { %v253_v42 = vpop.f32.mrb[0].mxu0  ;;  %v330_v43 = vpop.f32.mrb[0].mxu1 }
 0x233   :  { %v254_v45 = vadd.f32 %v253_v42, %v170_v37  ;;  %v331_v46 = vadd.f32 %v330_v43, %v178_v38  ;;  %v255_v47 = vpop.f32.mrb[1].mxu0  ;;  %v332_v48 = vpop.f32.mrb[1].mxu1 }
 0x234   :  { %v256_v49 = vadd.f32 %v255_v47, %v174_v39  ;;  %v333_v50 = vadd.f32 %v332_v48, %v182_v41 }
 0x235   :  { %v341_v55 = vmax.f32 %v254_v45, 0.0  ;;  %v343_v56 = vmax.f32 %v331_v46, 0.0 }
 0x236   :  { %v342_v51 = vmax.f32 %v256_v49, 0.0  ;;  %v344_v52 = vmax.f32 %v333_v50, 0.0  ;;  %v259_v53 = vpop.f32.mrb[2].mxu0  ;;  %v336_v54 = vpop.f32.mrb[2].mxu1 }
 0x237   :  { %v260_v57 = vadd.f32 %v259_v53, %v170_v37  ;;  %v337_v58 = vadd.f32 %v336_v54, %v178_v38  ;;  %v261_v59 = vpop.f32.mrb[3].mxu0  ;;  %v338_v60 = vpop.f32.mrb[3].mxu1 }
 0x238   :  { %v262_v61 = vadd.f32 %v261_v59, %v174_v39  ;;  %v339_v62 = vadd.f32 %v338_v60, %v182_v41  ;;  %484 = vmatprep.mubr.f32.mxu0 %v342_v51  ;;  %559 = vmatprep.mubr.f32.mxu1 %v344_v52 }
 0x239   :  { %485 = vmatmul.mubr.f32.vlgmr.msra.gmra.mrb[4].mxu0 %v341_v55  ;;  %560 = vmatmul.mubr.f32.vlgmr.msra.gmra.mrb[4].mxu1 %v343_v56  ;;  %v345_v1 = vmax.f32 %v260_v57, 0.0  ;;  %v347_v2 = vmax.f32 %v337_v58, 0.0 }
 0x23a   :  { %v346_v63 = vmax.f32 %v262_v61, 0.0  ;;  %v348_v0 = vmax.f32 %v339_v62, 0.0 }
 0x23c   :  { %489 = vmatprep.mubr.f32.mxu0 %v346_v63  ;;  %564 = vmatprep.mubr.f32.mxu1 %v348_v0 }
 0x23d   :  { %490 = vmatmul.mubr.f32.gmra.mrb[6].mxu0 %v345_v1  ;;  %565 = vmatmul.mubr.f32.gmra.mrb[6].mxu1 %v347_v2 }
 0x30c   :  { %v639_v3 = vpop.f32.mrb[4].mxu0  ;;  %v677_v4 = vpop.f32.mrb[4].mxu1 }
 0x30d   :  { %v640_v6 = vpop.f32.mrb[5].mxu0  ;;  %v678_v7 = vpop.f32.mrb[5].mxu1 }
 0x30e   :  { %v641_v8 = vadd.f32 %v640_v6, %v639_v3  ;;  %v679_v9 = vadd.f32 %v678_v7, %v677_v4 }
 0x310   :  { %v487_v40 = vadd.f32 %v641_v8, %v606_v5  ;;  %v642_v11 = vpop.f32.mrb[6].mxu0  ;;  %v680_v12 = vpop.f32.mrb[6].mxu1 }
 0x311   :  { %v643_v13 = vpop.f32.mrb[7].mxu0  ;;  %v681_v14 = vpop.f32.mrb[7].mxu1 }
 0x312   :  { %v644_v15 = vadd.f32 %v643_v13, %v642_v11  ;;  %v682_v16 = vadd.f32 %v681_v14, %v680_v12  ;;  %v562_v17 = vadd.f32 %v679_v9, %v487_v40 }
 0x314   :  { %v492_v18 = vadd.f32 %v644_v15, %v606_v5  ;;  %v582_v19 = vmul.f32 %v575_v10, %v562_v17 }
 0x316   :  { %584 = vst [vmem:[#allocation7] sm:$0xff] %v582_v19  ;;  %v567_v44 = vadd.f32 %v682_v16, %v492_v18 }
 0x318   :  { %v583_v21 = vmul.f32 %v580_v20, %v567_v44 }
 0x31a   :  { %585 = vst [vmem:[#allocation7 + $0x8] sm:$0xff] %v583_v21 }
 0x31b   :  { %881 = shalt.err (!%p878_p6)
}
 0x31c   :  { %s882_s24 = scalar_lea.hbm %s1040_s8, 256 }
 0x31d   :  { %p883_p7 = scmp.ne.s32.totalorder %s1040_s8, %s882_s24  ;;  %p886_p8 = scmp.lt.u32.totalorder %s882_s24, %s1040_s8 }
 0x31f   :  { %p888_p9 = pnand %p886_p8, %p883_p7 }
 0x321   :  { %891 = shalt.err (!%p888_p9)
}
 0x322   :  { %597 = dma.vmem_to_hbm [thread:$0]  %s592_s21, 256, %s1040_s8, [#allocation4], %s902_s4, %s902_s4, %s903_s28  }
 0x323   :  { %896 = dma.done.wait [#allocation4], 256  }
 0x324   :  { %897 = vsyncadd [#allocation4], 4294967040 }
 0x325   :  { %601 = vsyncpa [#allocation3], 1 }
 0x326   :  { %602 = vsyncpa [#allocation6], 1 }
 0x327   :  { %603 = vsyncpa [#allocation4], 1 }

// kernel: tpu_custom_call.1
= control target key start
LH: loop header
LB: loop body
LE: loop exit
PB: predicated region body
PF: predicated region fallthrough
CT: control target
= control target key end

     0   :  { %13 = vsyncpa [#allocation3], 0  ;;  %s1032_s0 = inlined_call_operand.vmem [shape: f32[16,128], index: 0, kind: input, shape index: {}]   ;;  %s1033_s1 = inlined_call_operand.vmem [shape: f32[16,1], index: 1, kind: input, shape index: {}]   ;;  %s1034_s2 = inlined_call_operand.vmem [shape: f32[1,128], index: 2, kind: input, shape index: {}]   ;;  %s1035_s3 = inlined_call_operand.vmem [shape: f32[1,128], index: 3, kind: input, shape index: {}]   ;;  %s1036_s4 = inlined_call_operand.hbm [shape: f32[128,512], index: 4, kind: input, shape index: {}]   ;;  %s1037_s5 = inlined_call_operand.vmem [shape: f32[1,512], index: 5, kind: input, shape index: {}]   ;;  %s1038_s6 = inlined_call_operand.hbm [shape: f32[512,128], index: 6, kind: input, shape index: {}]   ;;  %s1039_s7 = inlined_call_operand.vmem [shape: f32[1,128], index: 7, kind: input, shape index: {}]   ;;  %s1040_s8 = inlined_call_operand.hbm [shape: f32[16,128], index: 8, kind: output, shape index: {}]  }
   0x1   :  { %14 = vsyncpa [#allocation6], 0 }
   0x2   :  { %15 = vsyncpa [#allocation4], 0  ;;  %s898_s27 = smov [#allocation2]   ;;  %s826_s9 = scalar_lea.hbm %s1036_s4, 8192 }
   0x3   :  { %s29_s28 = sshll.u32 %s898_s27, 4  ;;  %p827_p0 = scmp.ne.s32.totalorder %s1036_s4, %s826_s9  ;;  %s30_s28 = int_to_ptr.vmem [resolvable:$true] %s29_s28 }
   0x4   :  { %p830_p1 = scmp.lt.u32.totalorder %s826_s9, %s1036_s4 }
   0x6   :  { %p832_p2 = pnand %p830_p1, %p827_p0 }
   0x8   :  { %835 = shalt.err (!%p832_p2)
}
   0x9   :  { %s836_s14 = scalar_lea.vmem %s30_s28, 8192  ;;  %p841_p4 = scmp.lt.s32.totalorder %s30_s28, %s30_s28 }
   0xa   :  { %p837_p3 = scmp.ne.s32.totalorder %s30_s28, %s836_s14  ;;  %p842_p5 = scmp.lt.s32.totalorder %s836_s14, %s836_s14 }
   0xc   :  { %p843_p6 = por %p842_p5, %p841_p4 }
   0xe   :  { %p844_p7 = pnand %p843_p6, %p837_p3 }
  0x10   :  { %847 = shalt.err (!%p844_p7)
}
  0x11   :  { %s899_s15 = smov 512   ;;  %s900_s16 = smov 32  }
  0x12   :  { %35 = dma.hbm_to_vmem [thread:$0]  %s1036_s4, 8192, %s30_s28, [#allocation3], %s899_s15, %s899_s15, %s900_s16  }
  0x13   :  { %s901_s19 = smov [#allocation5]   ;;  %s848_s23 = scalar_lea.hbm %s1038_s6, 8192 }
  0x14   :  { %s43_s20 = sshll.u32 %s901_s19, 4  ;;  %p849_p8 = scmp.ne.s32.totalorder %s1038_s6, %s848_s23  ;;  %s44_s20 = int_to_ptr.vmem [resolvable:$true] %s43_s20 }
  0x15   :  { %p852_p9 = scmp.lt.u32.totalorder %s848_s23, %s1038_s6 }
  0x17   :  { %p854_p10 = pnand %p852_p9, %p849_p8 }
  0x19   :  { %857 = shalt.err (!%p854_p10)
}
  0x1a   :  { %s858_s29 = scalar_lea.vmem %s44_s20, 8192  ;;  %p863_p12 = scmp.lt.s32.totalorder %s44_s20, %s44_s20 }
  0x1b   :  { %p859_p11 = scmp.ne.s32.totalorder %s44_s20, %s858_s29  ;;  %p864_p13 = scmp.lt.s32.totalorder %s858_s29, %s858_s29 }
  0x1d   :  { %p865_p0 = por %p864_p13, %p863_p12 }
  0x1f   :  { %p866_p1 = pnand %p865_p0, %p859_p11 }
  0x21   :  { %869 = shalt.err (!%p866_p1)
}
  0x22   :  { %s902_s4 = smov 128   ;;  %s903_s28 = smov 8  }
  0x23   :  { %49 = dma.hbm_to_vmem [thread:$0]  %s1038_s6, 8192, %s44_s20, [#allocation6], %s902_s4, %s902_s4, %s903_s28  }
  0x24   :  { %892 = dma.done.wait [#allocation3], 8192  }
  0x25   :  { %893 = vsyncadd [#allocation3], 4294959104 }
  0x26   :  { %894 = dma.done.wait [#allocation6], 8192  }
  0x27   :  { %895 = vsyncadd [#allocation6], 4294959104  ;;  %v58_v0 = vld [vmem:[%s1032_s0] sm:$0xff]  ;;  %v59_v1 = vld [vmem:[%s1032_s0 + $0x8] sm:$0xff]  ;;  %s906_s20 = smov [#allocation7]  }
  0x28   :  { %60 = vadd.xlane.f32.xlu0 %v58_v0  ;;  %v102_v2 = vld [vmem:[#allocation2 + $0x8] sm:$0xff]  ;;  %v104_v4 = vld [vmem:[#allocation2 + $0x18] sm:$0xff]  ;;  %v101_v7 = vld [vmem:[#allocation2] sm:$0xff]  ;;  %s591_s21 = sshll.u32 %s906_s20, 4  ;;  %s592_s21 = int_to_ptr.vmem [resolvable:$true] %s591_s21 }
  0x29   :  { %v106_v3 = vld [vmem:[#allocation2 + $0x28] sm:$0xff]  ;;  %v108_v6 = vld [vmem:[#allocation2 + $0x38] sm:$0xff]  ;;  %v105_v8 = vld [vmem:[#allocation2 + $0x20] sm:$0xff]  ;;  %p875_p3 = scmp.lt.s32.totalorder %s592_s21, %s592_s21 }
  0x2a   :  { %v683_v5 = vpack.c.bf16 %v106_v3, %v102_v2  ;;  %v715_v9 = vpack.c.bf16 %v108_v6, %v104_v4  ;;  %v685_v10 = vpack.c.bf16 %v105_v8, %v101_v7  ;;  %v103_v11 = vld [vmem:[#allocation2 + $0x10] sm:$0xff]  ;;  %v110_v13 = vld [vmem:[#allocation2 + $0x48] sm:$0xff]  ;;  %v112_v16 = vld [vmem:[#allocation2 + $0x58] sm:$0xff] }
  0x2b   :  { %v107_v12 = vld [vmem:[#allocation2 + $0x30] sm:$0xff]  ;;  %v114_v15 = vld [vmem:[#allocation2 + $0x68] sm:$0xff]  ;;  %v116_v17 = vld [vmem:[#allocation2 + $0x78] sm:$0xff] }
  0x2c   :  { %62 = vadd.xlane.f32.xlu0 %v59_v1  ;;  %684 = vmatprep.subr.bf16.mxu0 %v683_v5  ;;  %v717_v14 = vpack.c.bf16 %v107_v12, %v103_v11  ;;  %v687_v18 = vpack.c.bf16 %v114_v15, %v110_v13  ;;  %v719_v19 = vpack.c.bf16 %v116_v17, %v112_v16  ;;  %v109_v20 = vld [vmem:[#allocation2 + $0x40] sm:$0xff]  ;;  %v111_v22 = vld [vmem:[#allocation2 + $0x50] sm:$0xff]  ;;  %v118_v25 = vld [vmem:[#allocation2 + $0x88] sm:$0xff] }
  0x2d   :  { %716 = vmatprep.subr.bf16.mxu1 %v715_v9  ;;  %686 = vmatpush1.bf16.msra.mxu0 %v685_v10  ;;  %v113_v21 = vld [vmem:[#allocation2 + $0x60] sm:$0xff]  ;;  %v115_v24 = vld [vmem:[#allocation2 + $0x70] sm:$0xff]  ;;  %v122_v26 = vld [vmem:[#allocation2 + $0xa8] sm:$0xff] }
  0x2e   :  { %718 = vmatpush1.bf16.msra.mxu1 %v717_v14  ;;  %v689_v23 = vpack.c.bf16 %v113_v21, %v109_v20  ;;  %688 = vmatprep.subr.bf16.mxu0 %v687_v18  ;;  %v721_v27 = vpack.c.bf16 %v115_v24, %v111_v22  ;;  %v691_v28 = vpack.c.bf16 %v122_v26, %v118_v25  ;;  %v120_v29 = vld [vmem:[#allocation2 + $0x98] sm:$0xff]  ;;  %v117_v31 = vld [vmem:[#allocation2 + $0x80] sm:$0xff]  ;;  %v119_v34 = vld [vmem:[#allocation2 + $0x90] sm:$0xff]  ;;  %v904_v22 = vmov 0.0  }
  0x2f   :  { %720 = vmatprep.subr.bf16.mxu1 %v719_v19  ;;  %v124_v30 = vld [vmem:[#allocation2 + $0xb8] sm:$0xff]  ;;  %v121_v33 = vld [vmem:[#allocation2 + $0xa0] sm:$0xff]  ;;  %v123_v35 = vld [vmem:[#allocation2 + $0xb0] sm:$0xff]  ;;  %251 = vmatprep.mubr.f32.mxu0 %v904_v22 }
  0x30   :  { %v723_v32 = vpack.c.bf16 %v124_v30, %v120_v29  ;;  %v693_v36 = vpack.c.bf16 %v121_v33, %v117_v31  ;;  %v725_v37 = vpack.c.bf16 %v123_v35, %v119_v34  ;;  %v126_v46 = vld [vmem:[#allocation2 + $0xc8] sm:$0xff]  ;;  %v128_v48 = vld [vmem:[#allocation2 + $0xd8] sm:$0xff]  ;;  %v125_v51 = vld [vmem:[#allocation2 + $0xc0] sm:$0xff]  ;;  %328 = vmatprep.mubr.f32.mxu1 %v904_v22 }
  0x31   :  { %690 = vmatpush1.bf16.msra.mxu0 %v689_v23  ;;  %v130_v47 = vld [vmem:[#allocation2 + $0xe8] sm:$0xff]  ;;  %v132_v50 = vld [vmem:[#allocation2 + $0xf8] sm:$0xff]  ;;  %v129_v52 = vld [vmem:[#allocation2 + $0xe0] sm:$0xff] }
  0x32   :  { %722 = vmatpush1.bf16.msra.mxu1 %v721_v27  ;;  %692 = vmatprep.subr.bf16.mxu0 %v691_v28  ;;  %v695_v49 = vpack.c.bf16 %v130_v47, %v126_v46  ;;  %v727_v53 = vpack.c.bf16 %v132_v50, %v128_v48  ;;  %v697_v54 = vpack.c.bf16 %v129_v52, %v125_v51  ;;  %v127_v55 = vld [vmem:[#allocation2 + $0xd0] sm:$0xff]  ;;  %v134_v58 = vld [vmem:[#allocation2 + $0x108] sm:$0xff]  ;;  %v136_v60 = vld [vmem:[#allocation2 + $0x118] sm:$0xff] }
  0x33   :  { %724 = vmatprep.subr.bf16.mxu1 %v723_v32  ;;  %v131_v56 = vld [vmem:[#allocation2 + $0xf0] sm:$0xff]  ;;  %v138_v59 = vld [vmem:[#allocation2 + $0x128] sm:$0xff]  ;;  %v140_v62 = vld [vmem:[#allocation2 + $0x138] sm:$0xff] }
  0x34   :  { %v729_v57 = vpack.c.bf16 %v131_v56, %v127_v55  ;;  %v699_v61 = vpack.c.bf16 %v138_v59, %v134_v58  ;;  %v133_v63 = vld [vmem:[#allocation2 + $0x100] sm:$0xff]  ;;  %v135_v3 = vld [vmem:[#allocation2 + $0x110] sm:$0xff]  ;;  %v142_v6 = vld [vmem:[#allocation2 + $0x148] sm:$0xff] }
  0x35   :  { %694 = vmatpush1.bf16.msra.mxu0 %v693_v36  ;;  %v139_v4 = vld [vmem:[#allocation2 + $0x130] sm:$0xff]  ;;  %v146_v7 = vld [vmem:[#allocation2 + $0x168] sm:$0xff]  ;;  %v144_v8 = vld [vmem:[#allocation2 + $0x158] sm:$0xff] }
  0x36   :  { %726 = vmatpush1.bf16.msra.mxu1 %v725_v37  ;;  %696 = vmatprep.subr.bf16.mxu0 %v695_v49  ;;  %v733_v5 = vpack.c.bf16 %v139_v4, %v135_v3  ;;  %v703_v9 = vpack.c.bf16 %v146_v7, %v142_v6  ;;  %v148_v10 = vld [vmem:[#allocation2 + $0x178] sm:$0xff]  ;;  %v141_v11 = vld [vmem:[#allocation2 + $0x140] sm:$0xff]  ;;  %v143_v15 = vld [vmem:[#allocation2 + $0x150] sm:$0xff] }
  0x37   :  { %728 = vmatprep.subr.bf16.mxu1 %v727_v53  ;;  %v145_v12 = vld [vmem:[#allocation2 + $0x160] sm:$0xff]  ;;  %v735_v13 = vpack.c.bf16 %v148_v10, %v144_v8  ;;  %v147_v16 = vld [vmem:[#allocation2 + $0x170] sm:$0xff]  ;;  %v150_v17 = vld [vmem:[#allocation2 + $0x188] sm:$0xff] }
  0x38   :  { %v705_v14 = vpack.c.bf16 %v145_v12, %v141_v11  ;;  %v737_v18 = vpack.c.bf16 %v147_v16, %v143_v15  ;;  %v154_v19 = vld [vmem:[#allocation2 + $0x1a8] sm:$0xff]  ;;  %v152_v20 = vld [vmem:[#allocation2 + $0x198] sm:$0xff]  ;;  %v149_v25 = vld [vmem:[#allocation2 + $0x180] sm:$0xff] }
  0x39   :  { %698 = vmatpush1.bf16.msra.mxu0 %v697_v54  ;;  %v156_v21 = vld [vmem:[#allocation2 + $0x1b8] sm:$0xff]  ;;  %v707_v23 = vpack.c.bf16 %v154_v19, %v150_v17  ;;  %v153_v26 = vld [vmem:[#allocation2 + $0x1a0] sm:$0xff]  ;;  %v151_v27 = vld [vmem:[#allocation2 + $0x190] sm:$0xff] }
  0x3a   :  { %730 = vmatpush1.bf16.msra.mxu1 %v729_v57  ;;  %700 = vmatprep.subr.bf16.mxu0 %v699_v61  ;;  %v739_v24 = vpack.c.bf16 %v156_v21, %v152_v20  ;;  %v709_v28 = vpack.c.bf16 %v153_v26, %v149_v25  ;;  %v155_v29 = vld [vmem:[#allocation2 + $0x1b0] sm:$0xff]  ;;  %v158_v30 = vld [vmem:[#allocation2 + $0x1c8] sm:$0xff]  ;;  %v160_v34 = vld [vmem:[#allocation2 + $0x1d8] sm:$0xff] }
  0x3b   :  { %v162_v31 = vld [vmem:[#allocation2 + $0x1e8] sm:$0xff]  ;;  %v741_v32 = vpack.c.bf16 %v155_v29, %v151_v27  ;;  %v164_v35 = vld [vmem:[#allocation2 + $0x1f8] sm:$0xff]  ;;  %v157_v36 = vld [vmem:[#allocation2 + $0x1c0] sm:$0xff] }
  0x3c   :  { %v711_v33 = vpack.c.bf16 %v162_v31, %v158_v30  ;;  %v743_v37 = vpack.c.bf16 %v164_v35, %v160_v34  ;;  %v366_v46 = vld [vmem:[#allocation5 + $0x88] sm:$0xff]  ;;  %v397_v47 = vld [vmem:[#allocation5 + $0x180] sm:$0xff]  ;;  %v368_v3 = vld [vmem:[#allocation5 + $0x98] sm:$0xff] }
  0x3d   :  { %v398_v49 = vld [vmem:[#allocation5 + $0x188] sm:$0xff]  ;;  %v604_v58 = vld [vmem:[%s1034_s2] ss:$0 sm:$0xff]  ;;  %v399_v4 = vld [vmem:[#allocation5 + $0x190] sm:$0xff] }
  0x3e   :  { %v779_v50 = vpack.c.bf16 %v398_v49, %v397_v47  ;;  %v349_v61 = vld [vmem:[#allocation5] sm:$0xff]  ;;  %v352_v11 = vld [vmem:[#allocation5 + $0x18] sm:$0xff]  ;;  %v402_v20 = vld [vmem:[#allocation5 + $0x1a8] sm:$0xff] }
  0x3f   :  { %v384_v15 = vld [vmem:[#allocation5 + $0x118] sm:$0xff]  ;;  %v369_v16 = vld [vmem:[#allocation5 + $0xa0] sm:$0xff]  ;;  %v354_v25 = vld [vmem:[#allocation5 + $0x28] sm:$0xff] }
  0x40   :  { %v401_v19 = vld [vmem:[#allocation5 + $0x1a0] sm:$0xff]  ;;  %v386_v29 = vld [vmem:[#allocation5 + $0x128] sm:$0xff]  ;;  %v371_v30 = vld [vmem:[#allocation5 + $0xb0] sm:$0xff] }
  0x41   :  { %v787_v27 = vpack.c.bf16 %v402_v20, %v401_v19  ;;  %v372_v31 = vld [vmem:[#allocation5 + $0xb8] sm:$0xff]  ;;  %v355_v35 = vld [vmem:[#allocation5 + $0x30] sm:$0xff]  ;;  %v357_v49 = vld [vmem:[#allocation5 + $0x40] sm:$0xff] }
  0x42   :  { %v412_v20 = vld [vmem:[#allocation5 + $0x1f8] sm:$0xff] }
  0xb5   :  { %v61_v38 = vpop.xlane.xlu0 %60 }
  0xb6   :  { %v65_v39 = vmul.f32 0.0078125, %v61_v38  ;;  %v161_v38 = vld [vmem:[#allocation2 + $0x1e0] sm:$0xff] }
  0xb8   :  { %v985_v40 = vsub.f32 %v58_v0, %v65_v39  ;;  %v137_v0 = vld [vmem:[#allocation2 + $0x120] sm:$0xff]  ;;  %v159_v39 = vld [vmem:[#allocation2 + $0x1d0] sm:$0xff] }
  0xb9   :  { %v63_v41 = vpop.xlane.xlu0 %62  ;;  %v701_v2 = vpack.c.bf16 %v137_v0, %v133_v63  ;;  %v381_v63 = vld [vmem:[#allocation5 + $0x100] sm:$0xff]  ;;  %v382_v0 = vld [vmem:[#allocation5 + $0x108] sm:$0xff] }
  0xba   :  { %v66_v42 = vmul.f32 0.0078125, %v63_v41  ;;  %v69_v43 = vmul.f32 %v985_v40, %v985_v40  ;;  %v163_v41 = vld [vmem:[#allocation2 + $0x1f0] sm:$0xff]  ;;  %v781_v10 = vpack.c.bf16 %v382_v0, %v381_v63 }
  0xbb   :  { %702 = vmatpush1.bf16.msra.mxu0 %v701_v2 }
  0xbc   :  { %v989_v44 = vsub.f32 %v59_v1, %v66_v42  ;;  %71 = vadd.xlane.f32.xlu1 %v69_v43  ;;  %v731_v1 = vpack.c.bf16 %v140_v62, %v136_v60  ;;  %704 = vmatprep.subr.bf16.mxu0 %v703_v9  ;;  %v713_v42 = vpack.c.bf16 %v161_v38, %v157_v36  ;;  %v605_v60 = vld [vmem:[%s1035_s3] ss:$0 sm:$0xff]  ;;  %v350_v62 = vld [vmem:[#allocation5 + $0x8] sm:$0xff]  ;;  %v356_v36 = vld [vmem:[#allocation5 + $0x38] sm:$0xff] }
  0xbd   :  { %v745_v43 = vpack.c.bf16 %v163_v41, %v159_v39  ;;  %v749_v9 = vpack.c.bf16 %v350_v62, %v349_v61  ;;  %v387_v39 = vld [vmem:[#allocation5 + $0x130] sm:$0xff]  ;;  %v388_v41 = vld [vmem:[#allocation5 + $0x138] sm:$0xff]  ;;  %v761_v47 = vpack.c.bf16 %v356_v36, %v355_v35 }
  0xbe   :  { %v70_v45 = vmul.f32 %v989_v44, %v989_v44  ;;  %732 = vmatprep.subr.bf16.mxu1 %v731_v1  ;;  %v367_v1 = vld [vmem:[#allocation5 + $0x90] sm:$0xff]  ;;  %v360_v62 = vld [vmem:[#allocation5 + $0x58] sm:$0xff] }
  0xbf   :  { %734 = vmatpush1.bf16.msra.mxu1 %v733_v5  ;;  %706 = vmatpush1.bf16.msra.mxu0 %v705_v14  ;;  %v400_v5 = vld [vmem:[#allocation5 + $0x198] sm:$0xff]  ;;  %v751_v12 = vpack.c.bf16 %v368_v3, %v367_v1  ;;  %v383_v14 = vld [vmem:[#allocation5 + $0x110] sm:$0xff]  ;;  %v377_v3 = vld [vmem:[#allocation5 + $0xe0] sm:$0xff] }
  0xc0   :  { %73 = vadd.xlane.f32.xlu1 %v70_v45  ;;  %736 = vmatprep.subr.bf16.mxu1 %v735_v13  ;;  %v365_v45 = vld [vmem:[#allocation5 + $0x80] sm:$0xff]  ;;  %v783_v13 = vpack.c.bf16 %v400_v5, %v399_v4  ;;  %v359_v61 = vld [vmem:[#allocation5 + $0x50] sm:$0xff]  ;;  %v378_v4 = vld [vmem:[#allocation5 + $0xe8] sm:$0xff] }
  0xc1   :  { %708 = vmatprep.subr.bf16.mxu0 %v707_v23  ;;  %v747_v48 = vpack.c.bf16 %v366_v46, %v365_v45  ;;  %v785_v23 = vpack.c.bf16 %v384_v15, %v383_v14  ;;  %v405_v45 = vld [vmem:[#allocation5 + $0x1c0] sm:$0xff]  ;;  %v406_v46 = vld [vmem:[#allocation5 + $0x1c8] sm:$0xff]  ;;  %v391_v1 = vld [vmem:[#allocation5 + $0x150] sm:$0xff] }
  0xc2   :  { %v409_v5 = vld [vmem:[#allocation5 + $0x1e0] sm:$0xff]  ;;  %v394_v14 = vld [vmem:[#allocation5 + $0x168] sm:$0xff] }
  0xc3   :  { %738 = vmatpush1.bf16.msra.mxu1 %v737_v18  ;;  %710 = vmatpush1.bf16.msra.mxu0 %v709_v28  ;;  %v370_v18 = vld [vmem:[#allocation5 + $0xa8] sm:$0xff]  ;;  %v385_v28 = vld [vmem:[#allocation5 + $0x120] sm:$0xff] }
  0xc4   :  { %740 = vmatprep.subr.bf16.mxu1 %v739_v24  ;;  %712 = vmatprep.subr.bf16.mxu0 %v711_v33  ;;  %v353_v24 = vld [vmem:[#allocation5 + $0x20] sm:$0xff]  ;;  %v755_v26 = vpack.c.bf16 %v370_v18, %v369_v16  ;;  %v404_v33 = vld [vmem:[#allocation5 + $0x1b8] sm:$0xff]  ;;  %v789_v34 = vpack.c.bf16 %v386_v29, %v385_v28  ;;  %v379_v16 = vld [vmem:[#allocation5 + $0xf0] sm:$0xff] }
  0xc5   :  { %v411_v18 = vld [vmem:[#allocation5 + $0x1f0] sm:$0xff]  ;;  %v570_v28 = vld [vmem:[%s1033_s1] sm:$0xff]  ;;  %v571_v29 = vld [vmem:[%s1033_s1 + $0x8] sm:$0xff] }
  0xc7   :  { %742 = vmatpush1.bf16.msra.mxu1 %v741_v32  ;;  %714 = vmatpush1.bf16.msra.mxu0 %v713_v42  ;;  %v403_v32 = vld [vmem:[#allocation5 + $0x1b0] sm:$0xff]  ;;  %v373_v42 = vld [vmem:[#allocation5 + $0xc0] sm:$0xff] }
  0xc8   :  { %744 = vmatprep.subr.bf16.mxu1 %v743_v37  ;;  %748 = vmatprep.subr.bf16.mxu0 %v747_v48  ;;  %v759_v37 = vpack.c.bf16 %v372_v31, %v371_v30  ;;  %v791_v38 = vpack.c.bf16 %v404_v33, %v403_v32  ;;  %v793_v48 = vpack.c.bf16 %v388_v41, %v387_v39  ;;  %v905_v30 = vmov 0  }
  0xc9   :  { %820 = vset.pattern.permute.xlu0 %v905_v30  ;;  %821 = vset.pattern.permute.xlu1 %v905_v30  ;;  %v167_v31 = vlaneseq }
  0xca   :  { %574 = vperm.xlu0 %820, %v570_v28  }
  0xcb   :  { %746 = vmatpush1.bf16.msra.mxu1 %v745_v43  ;;  %v374_v43 = vld [vmem:[#allocation5 + $0xc8] sm:$0xff]  ;;  %v168_v32 = vshrl.u32 %v167_v31, 7 }
  0xcc   :  { %780 = vmatprep.subr.bf16.mxu1 %v779_v50  ;;  %v358_v50 = vld [vmem:[#allocation5 + $0x48] sm:$0xff] }
  0xcd   :  { %v169_v33 = vsub.s32 0, %v168_v32  ;;  %v173_v35 = vsub.s32 1, %v168_v32  ;;  %v181_v36 = vsub.s32 3, %v168_v32 }
  0xd1   :  { %579 = vperm.xlu1 %821, %v571_v29  }
 0x149   :  { %v72_v51 = vpop.xlane.xlu1 %71 }
 0x14a   :  { %v75_v52 = vmul.f32 0.0078125, %v72_v51  ;;  %v763_v51 = vpack.c.bf16 %v374_v43, %v373_v42 }
 0x14c   :  { %v77_v53 = vadd.f32 1e-05, %v75_v52  ;;  %v795_v52 = vpack.c.bf16 %v406_v46, %v405_v45 }
 0x14d   :  { %v74_v54 = vpop.xlane.xlu1 %73 }
 0x14e   :  { %822 = vrsqrt.f32 %v77_v53  ;;  %v76_v55 = vmul.f32 0.0078125, %v74_v54  ;;  %v389_v53 = vld [vmem:[#allocation5 + $0x140] sm:$0xff]  ;;  %v390_v54 = vld [vmem:[#allocation5 + $0x148] sm:$0xff] }
 0x150   :  { %v78_v56 = vadd.f32 1e-05, %v76_v55  ;;  %v375_v55 = vld [vmem:[#allocation5 + $0xd0] sm:$0xff] }
 0x152   :  { %824 = vrsqrt.f32 %v78_v56  ;;  %v376_v56 = vld [vmem:[#allocation5 + $0xd8] sm:$0xff] }
 0x153   :  { %v767_v63 = vpack.c.bf16 %v376_v56, %v375_v55 }
 0x158   :  { %v823_v57 = vpop.eup %822 }
 0x159   :  { %v81_v59 = vmul.f32 %v823_v57, %v985_v40  ;;  %v351_v40 = vld [vmem:[#allocation5 + $0x10] sm:$0xff] }
 0x15a   :  { %v753_v21 = vpack.c.bf16 %v352_v11, %v351_v40  ;;  %v407_v57 = vld [vmem:[#allocation5 + $0x1d0] sm:$0xff]  ;;  %v361_v40 = vld [vmem:[#allocation5 + $0x60] sm:$0xff]  ;;  %v362_v11 = vld [vmem:[#allocation5 + $0x68] sm:$0xff] }
 0x15b   :  { %v90_v2 = vmul.f32 %v604_v58, %v81_v59  ;;  %v765_v59 = vpack.c.bf16 %v358_v50, %v357_v49 }
 0x15c   :  { %v825_v6 = vpop.eup %824 }
 0x15d   :  { %v99_v7 = vadd.f32 %v605_v60, %v90_v2  ;;  %v82_v8 = vmul.f32 %v825_v6, %v989_v44  ;;  %v392_v2 = vld [vmem:[#allocation5 + $0x158] sm:$0xff]  ;;  %v410_v6 = vld [vmem:[#allocation5 + $0x1e8] sm:$0xff] }
 0x15f   :  { %252 = vmatmul.mubr.f32.vlgmr.msra.gmra.mrb[0].mxu0 %v99_v7  ;;  %329 = vmatmul.mubr.f32.vlgmr.msra.gmra.mrb[0].mxu1 %v99_v7  ;;  %v91_v17 = vmul.f32 %v604_v58, %v82_v8  ;;  %v408_v58 = vld [vmem:[#allocation5 + $0x1d8] sm:$0xff]  ;;  %v769_v7 = vpack.c.bf16 %v360_v62, %v359_v61  ;;  %v801_v8 = vpack.c.bf16 %v392_v2, %v391_v1 }
 0x160   :  { %257 = vmatprep.mubr.f32.mxu0 %v904_v22  ;;  %334 = vmatprep.mubr.f32.mxu1 %v904_v22  ;;  %v757_v22 = vpack.c.bf16 %v354_v25, %v353_v24  ;;  %v799_v0 = vpack.c.bf16 %v408_v58, %v407_v57  ;;  %v395_v25 = vld [vmem:[#allocation5 + $0x170] sm:$0xff] }
 0x161   :  { %v100_v44 = vadd.f32 %v605_v60, %v91_v17  ;;  %750 = vmatpush3.bf16.msra.mxu0 %v749_v9  ;;  %782 = vmatpush3.bf16.msra.mxu1 %v781_v10  ;;  %v797_v60 = vpack.c.bf16 %v390_v54, %v389_v53  ;;  %v771_v9 = vpack.c.bf16 %v378_v4, %v377_v3  ;;  %v380_v17 = vld [vmem:[#allocation5 + $0xf8] sm:$0xff] }
 0x162   :  { %752 = vmatprep.subr.bf16.mxu0 %v751_v12  ;;  %784 = vmatprep.subr.bf16.mxu1 %v783_v13  ;;  %v803_v10 = vpack.c.bf16 %v410_v6, %v409_v5  ;;  %v393_v12 = vld [vmem:[#allocation5 + $0x160] sm:$0xff]  ;;  %v773_v13 = vpack.c.bf16 %v362_v11, %v361_v40  ;;  %v775_v19 = vpack.c.bf16 %v380_v17, %v379_v16 }
 0x163   :  { %258 = vmatmul.mubr.f32.gmra.mrb[2].mxu0 %v100_v44  ;;  %335 = vmatmul.mubr.f32.gmra.mrb[2].mxu1 %v100_v44  ;;  %v805_v15 = vpack.c.bf16 %v394_v14, %v393_v12  ;;  %v363_v44 = vld [vmem:[#allocation5 + $0x70] sm:$0xff]  ;;  %v606_v5 = vld [vmem:[%s1039_s7] ss:$0 sm:$0xff]  ;;  %s870_s7 = scalar_lea.vmem %s592_s21, 256 }
 0x164   :  { %p871_p2 = scmp.ne.s32.totalorder %s592_s21, %s870_s7  ;;  %p876_p4 = scmp.lt.s32.totalorder %s870_s7, %s870_s7 }
 0x165   :  { %754 = vmatpush3.bf16.msra.mxu0 %v753_v21  ;;  %786 = vmatpush3.bf16.msra.mxu1 %v785_v23  ;;  %v364_v21 = vld [vmem:[#allocation5 + $0x78] sm:$0xff]  ;;  %v807_v23 = vpack.c.bf16 %v412_v20, %v411_v18  ;;  %v580_v20 = vpop.permute.xlu1 %579 }
 0x166   :  { %756 = vmatprep.subr.bf16.mxu0 %v755_v26  ;;  %788 = vmatprep.subr.bf16.mxu1 %v787_v27  ;;  %v777_v24 = vpack.c.bf16 %v364_v21, %v363_v44  ;;  %v396_v26 = vld [vmem:[#allocation5 + $0x178] sm:$0xff]  ;;  %p877_p5 = por %p876_p4, %p875_p3 }
 0x167   :  { %v809_v27 = vpack.c.bf16 %v396_v26, %v395_v25 }
 0x168   :  { %p878_p6 = pnand %p877_p5, %p871_p2 }
 0x169   :  { %758 = vmatpush3.bf16.msra.mxu0 %v757_v22  ;;  %790 = vmatpush3.bf16.msra.mxu1 %v789_v34  ;;  %v177_v22 = vsub.s32 2, %v168_v32  ;;  %v165_v34 = vld [vmem:[%s1037_s5] sm:$0xf] }
 0x16a   :  { %760 = vmatprep.subr.bf16.mxu0 %v759_v37  ;;  %792 = vmatprep.subr.bf16.mxu1 %v791_v38  ;;  %v170_v37 = vrot.slane %v165_v34, %v169_v33  ;;  %v174_v39 = vrot.slane %v165_v34, %v173_v35  ;;  %v182_v41 = vrot.slane %v165_v34, %v181_v36 }
 0x16b   :  { %v178_v38 = vrot.slane %v165_v34, %v177_v22 }
 0x16d   :  { %762 = vmatpush3.bf16.msra.mxu0 %v761_v47  ;;  %794 = vmatpush3.bf16.msra.mxu1 %v793_v48 }
 0x16e   :  { %764 = vmatprep.subr.bf16.mxu0 %v763_v51  ;;  %796 = vmatprep.subr.bf16.mxu1 %v795_v52 }
 0x171   :  { %766 = vmatpush3.bf16.msra.mxu0 %v765_v59  ;;  %798 = vmatpush3.bf16.msra.mxu1 %v797_v60 }
 0x172   :  { %768 = vmatprep.subr.bf16.mxu0 %v767_v63  ;;  %800 = vmatprep.subr.bf16.mxu1 %v799_v0 }
 0x175   :  { %770 = vmatpush3.bf16.msra.mxu0 %v769_v7  ;;  %802 = vmatpush3.bf16.msra.mxu1 %v801_v8 }
 0x176   :  { %772 = vmatprep.subr.bf16.mxu0 %v771_v9  ;;  %804 = vmatprep.subr.bf16.mxu1 %v803_v10  ;;  %v575_v10 = vpop.permute.xlu0 %574 }
 0x179   :  { %774 = vmatpush3.bf16.msra.mxu0 %v773_v13  ;;  %806 = vmatpush3.bf16.msra.mxu1 %v805_v15 }
 0x17a   :  { %776 = vmatprep.subr.bf16.mxu0 %v775_v19  ;;  %808 = vmatprep.subr.bf16.mxu1 %v807_v23 }
 0x17d   :  { %778 = vmatpush3.bf16.msra.mxu0 %v777_v24  ;;  %810 = vmatpush3.bf16.msra.mxu1 %v809_v27 }
 0x232   :  { %v253_v42 = vpop.f32.mrb[0].mxu0  ;;  %v330_v43 = vpop.f32.mrb[0].mxu1 }
 0x233   :  { %v254_v45 = vadd.f32 %v253_v42, %v170_v37  ;;  %v331_v46 = vadd.f32 %v330_v43, %v178_v38  ;;  %v255_v47 = vpop.f32.mrb[1].mxu0  ;;  %v332_v48 = vpop.f32.mrb[1].mxu1 }
 0x234   :  { %v256_v49 = vadd.f32 %v255_v47, %v174_v39  ;;  %v333_v50 = vadd.f32 %v332_v48, %v182_v41 }
 0x235   :  { %v341_v55 = vmax.f32 %v254_v45, 0.0  ;;  %v343_v56 = vmax.f32 %v331_v46, 0.0 }
 0x236   :  { %v342_v51 = vmax.f32 %v256_v49, 0.0  ;;  %v344_v52 = vmax.f32 %v333_v50, 0.0  ;;  %v259_v53 = vpop.f32.mrb[2].mxu0  ;;  %v336_v54 = vpop.f32.mrb[2].mxu1 }
 0x237   :  { %v260_v57 = vadd.f32 %v259_v53, %v170_v37  ;;  %v337_v58 = vadd.f32 %v336_v54, %v178_v38  ;;  %v261_v59 = vpop.f32.mrb[3].mxu0  ;;  %v338_v60 = vpop.f32.mrb[3].mxu1 }
 0x238   :  { %v262_v61 = vadd.f32 %v261_v59, %v174_v39  ;;  %v339_v62 = vadd.f32 %v338_v60, %v182_v41  ;;  %484 = vmatprep.mubr.f32.mxu0 %v342_v51  ;;  %559 = vmatprep.mubr.f32.mxu1 %v344_v52 }
 0x239   :  { %485 = vmatmul.mubr.f32.vlgmr.msra.gmra.mrb[4].mxu0 %v341_v55  ;;  %560 = vmatmul.mubr.f32.vlgmr.msra.gmra.mrb[4].mxu1 %v343_v56  ;;  %v345_v1 = vmax.f32 %v260_v57, 0.0  ;;  %v347_v2 = vmax.f32 %v337_v58, 0.0 }
 0x23a   :  { %v346_v63 = vmax.f32 %v262_v61, 0.0  ;;  %v348_v0 = vmax.f32 %v339_v62, 0.0 }
 0x23c   :  { %489 = vmatprep.mubr.f32.mxu0 %v346_v63  ;;  %564 = vmatprep.mubr.f32.mxu1 %v348_v0 }
 0x23d   :  { %490 = vmatmul.mubr.f32.gmra.mrb[6].mxu0 %v345_v1  ;;  %565 = vmatmul.mubr.f32.gmra.mrb[6].mxu1 %v347_v2 }
 0x30c   :  { %v639_v3 = vpop.f32.mrb[4].mxu0  ;;  %v677_v4 = vpop.f32.mrb[4].mxu1 }
 0x30d   :  { %v640_v6 = vpop.f32.mrb[5].mxu0  ;;  %v678_v7 = vpop.f32.mrb[5].mxu1 }
 0x30e   :  { %v641_v8 = vadd.f32 %v640_v6, %v639_v3  ;;  %v679_v9 = vadd.f32 %v678_v7, %v677_v4 }
 0x310   :  { %v487_v40 = vadd.f32 %v641_v8, %v606_v5  ;;  %v642_v11 = vpop.f32.mrb[6].mxu0  ;;  %v680_v12 = vpop.f32.mrb[6].mxu1 }
 0x311   :  { %v643_v13 = vpop.f32.mrb[7].mxu0  ;;  %v681_v14 = vpop.f32.mrb[7].mxu1 }
 0x312   :  { %v644_v15 = vadd.f32 %v643_v13, %v642_v11  ;;  %v682_v16 = vadd.f32 %v681_v14, %v680_v12  ;;  %v562_v17 = vadd.f32 %v679_v9, %v487_v40 }
 0x314   :  { %v492_v18 = vadd.f32 %v644_v15, %v606_v5  ;;  %v582_v19 = vmul.f32 %v575_v10, %v562_v17 }
 0x316   :  { %584 = vst [vmem:[#allocation7] sm:$0xff] %v582_v19  ;;  %v567_v44 = vadd.f32 %v682_v16, %v492_v18 }
 0x318   :  { %v583_v21 = vmul.f32 %v580_v20, %v567_v44 }
 0x31a   :  { %585 = vst [vmem:[#allocation7 + $0x8] sm:$0xff] %v583_v21 }
 0x31b   :  { %881 = shalt.err (!%p878_p6)
}
 0x31c   :  { %s882_s24 = scalar_lea.hbm %s1040_s8, 256 }
 0x31d   :  { %p883_p7 = scmp.ne.s32.totalorder %s1040_s8, %s882_s24  ;;  %p886_p8 = scmp.lt.u32.totalorder %s882_s24, %s1040_s8 }
 0x31f   :  { %p888_p9 = pnand %p886_p8, %p883_p7 }
 0x321   :  { %891 = shalt.err (!%p888_p9)
}
 0x322   :  { %597 = dma.vmem_to_hbm [thread:$0]  %s592_s21, 256, %s1040_s8, [#allocation4], %s902_s4, %s902_s4, %s903_s28  }
 0x323   :  { %896 = dma.done.wait [#allocation4], 256  }
 0x324   :  { %897 = vsyncadd [#allocation4], 4294967040 }
 0x325   :  { %601 = vsyncpa [#allocation3], 1 }
 0x326   :  { %602 = vsyncpa [#allocation6], 1 }
 0x327   :  { %603 = vsyncpa [#allocation4], 1 }

</bundles_post_ra>
